<compile_context>
chip_gen: v7x
topology: tpu7x:2x2x1
jax: 0.10.0
libtpu: 0.0.40
codegen_flags: <defaults>
</compile_context>

<pallas_src>
import functools

import jax
import jax.numpy as jnp
from jax.experimental import pallas as pl
from jax.experimental.pallas import tpu as pltpu

NUM_CLASSES = 100
EPS = 1e-5

# (c_in, c_out, followed_by_2x2_maxpool) for conv1..conv7 of My_Net2.
CONV_SPECS = (
    (3, 3, False),    # conv1 + bn + relu
    (3, 3, True),     # conv2 + bn + relu + pool1
    (3, 6, False),    # conv3 + bn + relu
    (6, 6, True),     # conv4 + bn + relu + pool2
    (6, 12, False),   # conv5 + bn + relu
    (12, 12, True),   # conv6 + bn + relu + pool3
    (12, 24, True),   # conv7 + bn + relu + pool4
)

_VMEM_SPEC = pl.BlockSpec(memory_space=pltpu.MemorySpace.VMEM)


# ----------------------------------------------------------------------------
# Pallas kernels (all operands fit in VMEM; single whole-array block).
# ----------------------------------------------------------------------------
@functools.lru_cache(maxsize=None)
def _conv_block_call(n_taps, K, M, c_out):
    """out(c_out, M) = relu( max_t( W(c_out, K) @ P_t(K, M) ) * scale + bias ).

    n_taps == 1 : conv + bias + folded-BN + ReLU.
    n_taps == 4 : the same followed by a fused 2x2 stride-2 max-pool (one
                  patch matrix per pooling tap, elementwise max of results).
    """

    def kernel(*refs):
        p_refs = refs[:n_taps]
        w_ref, s_ref, b_ref, o_ref = refs[n_taps:]
        w = w_ref[...]
        acc = jnp.dot(w, p_refs[0][...], preferred_element_type=jnp.float32)
        for p_ref in p_refs[1:]:
            acc = jnp.maximum(
                acc, jnp.dot(w, p_ref[...], preferred_element_type=jnp.float32))
        y = acc * s_ref[...] + b_ref[...]          # folded conv-bias + BatchNorm
        o_ref[...] = jnp.maximum(y, 0.0)           # ReLU

    return pl.pallas_call(
        kernel,
        in_specs=[_VMEM_SPEC] * (n_taps + 3),
        out_specs=_VMEM_SPEC,
        out_shape=jax.ShapeDtypeStruct((c_out, M), jnp.float32),
    )


@functools.lru_cache(maxsize=None)
def _fc_call(M, K, N):
    """out(M, N) = x(M, K) @ w(K, N) + b(1, N)."""

    def kernel(x_ref, w_ref, b_ref, o_ref):
        o_ref[...] = (jnp.dot(x_ref[...], w_ref[...],
                              preferred_element_type=jnp.float32) + b_ref[...])

    return pl.pallas_call(
        kernel,
        in_specs=[_VMEM_SPEC] * 3,
        out_specs=_VMEM_SPEC,
        out_shape=jax.ShapeDtypeStruct((M, N), jnp.float32),
    )


# ----------------------------------------------------------------------------
# Plain-JAX glue (fused by XLA inside the single outer jit).
# ----------------------------------------------------------------------------
def _conv_patches_T(x_nhwc, pool):
    """im2col for a 3x3 / stride-1 / pad-1 conv, transposed to (K, M).

    K is ordered (ky, kx, c_in); M is ordered (n, oh, ow).  Without pooling a
    single patch matrix covering every conv output position is returned; with
    a following 2x2 stride-2 max-pool, four patch matrices are returned (one
    per pooling tap), each covering the pooled output grid.
    """
    N, H, W, C = x_nhwc.shape
    xp = jnp.pad(x_nhwc, ((0, 0), (1, 1), (1, 1), (0, 0)))
    cols = [xp[:, ky:ky + H, kx:kx + W, :] for ky in range(3) for kx in range(3)]
    patches = jnp.concatenate(cols, axis=-1)          # (N, H, W, 9C)
    K = 9 * C
    if not pool:
        return [patches.reshape(N * H * W, K).T], (N, H, W)
    OH, OW = H // 2, W // 2
    taps = [patches[:, dy::2, dx::2, :].reshape(N * OH * OW, K).T
            for dy in range(2) for dx in range(2)]
    return taps, (N, OH, OW)


def conv_bn_relu_pool(x_nhwc, layer_params, pool):
    taps, (N, OH, OW) = _conv_patches_T(x_nhwc, pool)
    K, M = taps[0].shape
    c_out = layer_params["w"].shape[0]
    y = _conv_block_call(len(taps), K, M, c_out)(
        *taps, layer_params["w"], layer_params["s"], layer_params["b"])
    # (c_out, M) -> NHWC for the next layer's im2col.
    return y.reshape(c_out, N, OH, OW).transpose(1, 2, 3, 0)


@jax.jit
def mynet2_forward(params, x_nchw):
    x = jnp.transpose(x_nchw.astype(jnp.float32), (0, 2, 3, 1))   # NCHW -> NHWC
    for layer_params, (_, _, pool) in zip(params["convs"], CONV_SPECS):
        x = conv_bn_relu_pool(x, layer_params, pool)
    # torch: x.view(-1, 24) on an NCHW tensor -> reproduce the exact flatten order.
    x = jnp.transpose(x, (0, 3, 1, 2)).reshape(-1, 24)
    return _fc_call(x.shape[0], 24, NUM_CLASSES)(x, params["fc_w"], params["fc_b"])


# ----------------------------------------------------------------------------
# Deterministic synthetic parameters (shapes follow the PyTorch module).
# ----------------------------------------------------------------------------
def _conv_layer_params(key, cin, cout):
    k1, k2, k3, k4 = jax.random.split(key, 4)
    fan_in = 9 * cin
    w_hwio = jax.random.normal(k1, (3, 3, cin, cout), jnp.float32) * (2.0 / fan_in) ** 0.5
    bound = 1.0 / fan_in ** 0.5
    conv_b = jax.random.uniform(k2, (cout,), jnp.float32, -bound, bound)
    run_mean = 0.1 * jax.random.normal(k3, (cout,), jnp.float32)
    run_var = jax.random.uniform(k4, (cout,), jnp.float32, 0.5, 1.5)
    inv_std = 1.0 / jnp.sqrt(run_var + EPS)              # BN affine=False
    return {
        # (c_out, K) with K ordered (ky, kx, c_in) — matches _conv_patches_T.
        "w": w_hwio.reshape(fan_in, cout).T,
        "s": inv_std.reshape(cout, 1),
        "b": ((conv_b - run_mean) * inv_std).reshape(cout, 1),
    }


def build_params(key):
    cnt = [0]

    def nk():
        cnt[0] += 1
        return jax.random.fold_in(key, cnt[0])

    convs = [_conv_layer_params(nk(), cin, cout) for cin, cout, _ in CONV_SPECS]
    k1, k2 = jax.random.split(nk())
    bound = 1.0 / 24 ** 0.5
    fc_w = jax.random.uniform(k1, (24, NUM_CLASSES), jnp.float32, -bound, bound)
    fc_b = jax.random.uniform(k2, (1, NUM_CLASSES), jnp.float32, -bound, bound)
    return {"convs": convs, "fc_w": fc_w, "fc_b": fc_b}


if __name__ == "__main__":
    root = jax.random.PRNGKey(0)
    params = build_params(jax.random.fold_in(root, 1))
    # CIFAR-100 style input: (N=2, C=3, H=32, W=32).  After the 4 max-pools the
    # feature map is (2, 24, 2, 2), so x.view(-1, 24) yields 8 rows — exactly
    # as in the PyTorch reference.
    x = jax.random.normal(jax.random.fold_in(root, 2), (2, 3, 32, 32), jnp.float32)

    out = mynet2_forward(params, x)
    out = jax.block_until_ready(out)
    assert out.shape == (2 * 2 * 2, NUM_CLASSES), out.shape
    print("KERNEL_OK")
</pallas_src>

<mosaic_0001>
module attributes {stable_mosaic.version = 11 : i64} {
  func.func @kernel(%arg0: memref<27x2048xf32, #tpu.memory_space<vmem>>, %arg1: memref<3x27xf32, #tpu.memory_space<vmem>>, %arg2: memref<3x1xf32, #tpu.memory_space<vmem>>, %arg3: memref<3x1xf32, #tpu.memory_space<vmem>>, %arg4: memref<3x2048xf32, #tpu.memory_space<vmem>>) attributes {dimension_semantics = [], scalar_prefetch = 0 : i64, scratch_operands = 0 : i64, tpu.core_type = #tpu.core_type<tc>} {
    %c0 = arith.constant 0 : index
    %c0_0 = arith.constant 0 : index
    %0 = vector.load %arg1[%c0, %c0_0] : memref<3x27xf32, #tpu.memory_space<vmem>>, vector<3x27xf32>
    %c0_1 = arith.constant 0 : index
    %c0_2 = arith.constant 0 : index
    %1 = vector.load %arg0[%c0_1, %c0_2] : memref<27x2048xf32, #tpu.memory_space<vmem>>, vector<27x2048xf32>
    %cst = arith.constant dense<0.000000e+00> : vector<3x2048xf32>
    %2 = tpu.matmul %0, %1, %cst {dimension_numbers = #tpu.dot_dimension_numbers<[1], [0], [0], [1], [0, 0, 1, 1], [], []>} : vector<3x27xf32>, vector<27x2048xf32>, vector<3x2048xf32> -> vector<3x2048xf32>
    %c0_3 = arith.constant 0 : index
    %c0_4 = arith.constant 0 : index
    %3 = vector.load %arg2[%c0_3, %c0_4] : memref<3x1xf32, #tpu.memory_space<vmem>>, vector<3x1xf32>
    %4 = vector.broadcast %3 : vector<3x1xf32> to vector<3x2048xf32>
    %5 = arith.mulf %2, %4 : vector<3x2048xf32>
    %c0_5 = arith.constant 0 : index
    %c0_6 = arith.constant 0 : index
    %6 = vector.load %arg3[%c0_5, %c0_6] : memref<3x1xf32, #tpu.memory_space<vmem>>, vector<3x1xf32>
    %7 = vector.broadcast %6 : vector<3x1xf32> to vector<3x2048xf32>
    %8 = arith.addf %5, %7 : vector<3x2048xf32>
    %cst_7 = arith.constant 0.000000e+00 : f32
    %9 = vector.broadcast %cst_7 : f32 to vector<3x2048xf32>
    %10 = arith.maximumf %8, %9 : vector<3x2048xf32>
    %c0_8 = arith.constant 0 : index
    %c0_9 = arith.constant 0 : index
    %11 = vector.load %arg4[%c0_8, %c0_9] : memref<3x2048xf32, #tpu.memory_space<vmem>>, vector<3x2048xf32>
    tpu.vector_store %arg4[%c0_8, %c0_9], %10 {strides = array<i32>} : memref<3x2048xf32, #tpu.memory_space<vmem>>, vector<3x2048xf32>,
    return
  }
}

module attributes {stable_mosaic.version = 11 : i64} {
  func.func @kernel(%arg0: memref<27x512xf32, #tpu.memory_space<vmem>>, %arg1: memref<27x512xf32, #tpu.memory_space<vmem>>, %arg2: memref<27x512xf32, #tpu.memory_space<vmem>>, %arg3: memref<27x512xf32, #tpu.memory_space<vmem>>, %arg4: memref<3x27xf32, #tpu.memory_space<vmem>>, %arg5: memref<3x1xf32, #tpu.memory_space<vmem>>, %arg6: memref<3x1xf32, #tpu.memory_space<vmem>>, %arg7: memref<3x512xf32, #tpu.memory_space<vmem>>) attributes {dimension_semantics = [], scalar_prefetch = 0 : i64, scratch_operands = 0 : i64, tpu.core_type = #tpu.core_type<tc>} {
    %c0 = arith.constant 0 : index
    %c0_0 = arith.constant 0 : index
    %0 = vector.load %arg4[%c0, %c0_0] : memref<3x27xf32, #tpu.memory_space<vmem>>, vector<3x27xf32>
    %c0_1 = arith.constant 0 : index
    %c0_2 = arith.constant 0 : index
    %1 = vector.load %arg0[%c0_1, %c0_2] : memref<27x512xf32, #tpu.memory_space<vmem>>, vector<27x512xf32>
    %cst = arith.constant dense<0.000000e+00> : vector<3x512xf32>
    %2 = tpu.matmul %0, %1, %cst {dimension_numbers = #tpu.dot_dimension_numbers<[1], [0], [0], [1], [0, 0, 1, 1], [], []>} : vector<3x27xf32>, vector<27x512xf32>, vector<3x512xf32> -> vector<3x512xf32>
    %c0_3 = arith.constant 0 : index
    %c0_4 = arith.constant 0 : index
    %3 = vector.load %arg1[%c0_3, %c0_4] : memref<27x512xf32, #tpu.memory_space<vmem>>, vector<27x512xf32>
    %cst_5 = arith.constant dense<0.000000e+00> : vector<3x512xf32>
    %4 = tpu.matmul %0, %3, %cst_5 {dimension_numbers = #tpu.dot_dimension_numbers<[1], [0], [0], [1], [0, 0, 1, 1], [], []>} : vector<3x27xf32>, vector<27x512xf32>, vector<3x512xf32> -> vector<3x512xf32>
    %5 = arith.maximumf %2, %4 : vector<3x512xf32>
    %c0_6 = arith.constant 0 : index
    %c0_7 = arith.constant 0 : index
    %6 = vector.load %arg2[%c0_6, %c0_7] : memref<27x512xf32, #tpu.memory_space<vmem>>, vector<27x512xf32>
    %cst_8 = arith.constant dense<0.000000e+00> : vector<3x512xf32>
    %7 = tpu.matmul %0, %6, %cst_8 {dimension_numbers = #tpu.dot_dimension_numbers<[1], [0], [0], [1], [0, 0, 1, 1], [], []>} : vector<3x27xf32>, vector<27x512xf32>, vector<3x512xf32> -> vector<3x512xf32>
    %8 = arith.maximumf %5, %7 : vector<3x512xf32>
    %c0_9 = arith.constant 0 : index
    %c0_10 = arith.constant 0 : index
    %9 = vector.load %arg3[%c0_9, %c0_10] : memref<27x512xf32, #tpu.memory_space<vmem>>, vector<27x512xf32>
    %cst_11 = arith.constant dense<0.000000e+00> : vector<3x512xf32>
    %10 = tpu.matmul %0, %9, %cst_11 {dimension_numbers = #tpu.dot_dimension_numbers<[1], [0], [0], [1], [0, 0, 1, 1], [], []>} : vector<3x27xf32>, vector<27x512xf32>, vector<3x512xf32> -> vector<3x512xf32>
    %11 = arith.maximumf %8, %10 : vector<3x512xf32>
    %c0_12 = arith.constant 0 : index
    %c0_13 = arith.constant 0 : index
    %12 = vector.load %arg5[%c0_12, %c0_13] : memref<3x1xf32, #tpu.memory_space<vmem>>, vector<3x1xf32>
    %13 = vector.broadcast %12 : vector<3x1xf32> to vector<3x512xf32>
    %14 = arith.mulf %11, %13 : vector<3x512xf32>
    %c0_14 = arith.constant 0 : index
    %c0_15 = arith.constant 0 : index
    %15 = vector.load %arg6[%c0_14, %c0_15] : memref<3x1xf32, #tpu.memory_space<vmem>>, vector<3x1xf32>
    %16 = vector.broadcast %15 : vector<3x1xf32> to vector<3x512xf32>
    %17 = arith.addf %14, %16 : vector<3x512xf32>
    %cst_16 = arith.constant 0.000000e+00 : f32
    %18 = vector.broadcast %cst_16 : f32 to vector<3x512xf32>
    %19 = arith.maximumf %17, %18 : vector<3x512xf32>
    %c0_17 = arith.constant 0 : index
    %c0_18 = arith.constant 0 : index
    %20 = vector.load %arg7[%c0_17, %c0_18] : memref<3x512xf32, #tpu.memory_space<vmem>>, vector<3x512xf32>
    tpu.vector_store %arg7[%c0_17, %c0_18], %19 {strides = array<i32>} : memref<3x512xf32, #tpu.memory_space<vmem>>, vector<3x512xf32>,
    return
  }
}

module attributes {stable_mosaic.version = 11 : i64} {
  func.func @kernel(%arg0: memref<27x512xf32, #tpu.memory_space<vmem>>, %arg1: memref<6x27xf32, #tpu.memory_space<vmem>>, %arg2: memref<6x1xf32, #tpu.memory_space<vmem>>, %arg3: memref<6x1xf32, #tpu.memory_space<vmem>>, %arg4: memref<6x512xf32, #tpu.memory_space<vmem>>) attributes {dimension_semantics = [], scalar_prefetch = 0 : i64, scratch_operands = 0 : i64, tpu.core_type = #tpu.core_type<tc>} {
    %c0 = arith.constant 0 : index
    %c0_0 = arith.constant 0 : index
    %0 = vector.load %arg1[%c0, %c0_0] : memref<6x27xf32, #tpu.memory_space<vmem>>, vector<6x27xf32>
    %c0_1 = arith.constant 0 : index
    %c0_2 = arith.constant 0 : index
    %1 = vector.load %arg0[%c0_1, %c0_2] : memref<27x512xf32, #tpu.memory_space<vmem>>, vector<27x512xf32>
    %cst = arith.constant dense<0.000000e+00> : vector<6x512xf32>
    %2 = tpu.matmul %0, %1, %cst {dimension_numbers = #tpu.dot_dimension_numbers<[1], [0], [0], [1], [0, 0, 1, 1], [], []>} : vector<6x27xf32>, vector<27x512xf32>, vector<6x512xf32> -> vector<6x512xf32>
    %c0_3 = arith.constant 0 : index
    %c0_4 = arith.constant 0 : index
    %3 = vector.load %arg2[%c0_3, %c0_4] : memref<6x1xf32, #tpu.memory_space<vmem>>, vector<6x1xf32>
    %4 = vector.broadcast %3 : vector<6x1xf32> to vector<6x512xf32>
    %5 = arith.mulf %2, %4 : vector<6x512xf32>
    %c0_5 = arith.constant 0 : index
    %c0_6 = arith.constant 0 : index
    %6 = vector.load %arg3[%c0_5, %c0_6] : memref<6x1xf32, #tpu.memory_space<vmem>>, vector<6x1xf32>
    %7 = vector.broadcast %6 : vector<6x1xf32> to vector<6x512xf32>
    %8 = arith.addf %5, %7 : vector<6x512xf32>
    %cst_7 = arith.constant 0.000000e+00 : f32
    %9 = vector.broadcast %cst_7 : f32 to vector<6x512xf32>
    %10 = arith.maximumf %8, %9 : vector<6x512xf32>
    %c0_8 = arith.constant 0 : index
    %c0_9 = arith.constant 0 : index
    %11 = vector.load %arg4[%c0_8, %c0_9] : memref<6x512xf32, #tpu.memory_space<vmem>>, vector<6x512xf32>
    tpu.vector_store %arg4[%c0_8, %c0_9], %10 {strides = array<i32>} : memref<6x512xf32, #tpu.memory_space<vmem>>, vector<6x512xf32>,
    return
  }
}

module attributes {stable_mosaic.version = 11 : i64} {
  func.func @kernel(%arg0: memref<54x128xf32, #tpu.memory_space<vmem>>, %arg1: memref<54x128xf32, #tpu.memory_space<vmem>>, %arg2: memref<54x128xf32, #tpu.memory_space<vmem>>, %arg3: memref<54x128xf32, #tpu.memory_space<vmem>>, %arg4: memref<6x54xf32, #tpu.memory_space<vmem>>, %arg5: memref<6x1xf32, #tpu.memory_space<vmem>>, %arg6: memref<6x1xf32, #tpu.memory_space<vmem>>, %arg7: memref<6x128xf32, #tpu.memory_space<vmem>>) attributes {dimension_semantics = [], scalar_prefetch = 0 : i64, scratch_operands = 0 : i64, tpu.core_type = #tpu.core_type<tc>} {
    %c0 = arith.constant 0 : index
    %c0_0 = arith.constant 0 : index
    %0 = vector.load %arg4[%c0, %c0_0] : memref<6x54xf32, #tpu.memory_space<vmem>>, vector<6x54xf32>
    %c0_1 = arith.constant 0 : index
    %c0_2 = arith.constant 0 : index
    %1 = vector.load %arg0[%c0_1, %c0_2] : memref<54x128xf32, #tpu.memory_space<vmem>>, vector<54x128xf32>
    %cst = arith.constant dense<0.000000e+00> : vector<6x128xf32>
    %2 = tpu.matmul %0, %1, %cst {dimension_numbers = #tpu.dot_dimension_numbers<[1], [0], [0], [1], [0, 0, 1, 1], [], []>} : vector<6x54xf32>, vector<54x128xf32>, vector<6x128xf32> -> vector<6x128xf32>
    %c0_3 = arith.constant 0 : index
    %c0_4 = arith.constant 0 : index
    %3 = vector.load %arg1[%c0_3, %c0_4] : memref<54x128xf32, #tpu.memory_space<vmem>>, vector<54x128xf32>
    %cst_5 = arith.constant dense<0.000000e+00> : vector<6x128xf32>
    %4 = tpu.matmul %0, %3, %cst_5 {dimension_numbers = #tpu.dot_dimension_numbers<[1], [0], [0], [1], [0, 0, 1, 1], [], []>} : vector<6x54xf32>, vector<54x128xf32>, vector<6x128xf32> -> vector<6x128xf32>
    %5 = arith.maximumf %2, %4 : vector<6x128xf32>
    %c0_6 = arith.constant 0 : index
    %c0_7 = arith.constant 0 : index
    %6 = vector.load %arg2[%c0_6, %c0_7] : memref<54x128xf32, #tpu.memory_space<vmem>>, vector<54x128xf32>
    %cst_8 = arith.constant dense<0.000000e+00> : vector<6x128xf32>
    %7 = tpu.matmul %0, %6, %cst_8 {dimension_numbers = #tpu.dot_dimension_numbers<[1], [0], [0], [1], [0, 0, 1, 1], [], []>} : vector<6x54xf32>, vector<54x128xf32>, vector<6x128xf32> -> vector<6x128xf32>
    %8 = arith.maximumf %5, %7 : vector<6x128xf32>
    %c0_9 = arith.constant 0 : index
    %c0_10 = arith.constant 0 : index
    %9 = vector.load %arg3[%c0_9, %c0_10] : memref<54x128xf32, #tpu.memory_space<vmem>>, vector<54x128xf32>
    %cst_11 = arith.constant dense<0.000000e+00> : vector<6x128xf32>
    %10 = tpu.matmul %0, %9, %cst_11 {dimension_numbers = #tpu.dot_dimension_numbers<[1], [0], [0], [1], [0, 0, 1, 1], [], []>} : vector<6x54xf32>, vector<54x128xf32>, vector<6x128xf32> -> vector<6x128xf32>
    %11 = arith.maximumf %8, %10 : vector<6x128xf32>
    %c0_12 = arith.constant 0 : index
    %c0_13 = arith.constant 0 : index
    %12 = vector.load %arg5[%c0_12, %c0_13] : memref<6x1xf32, #tpu.memory_space<vmem>>, vector<6x1xf32>
    %13 = vector.broadcast %12 : vector<6x1xf32> to vector<6x128xf32>
    %14 = arith.mulf %11, %13 : vector<6x128xf32>
    %c0_14 = arith.constant 0 : index
    %c0_15 = arith.constant 0 : index
    %15 = vector.load %arg6[%c0_14, %c0_15] : memref<6x1xf32, #tpu.memory_space<vmem>>, vector<6x1xf32>
    %16 = vector.broadcast %15 : vector<6x1xf32> to vector<6x128xf32>
    %17 = arith.addf %14, %16 : vector<6x128xf32>
    %cst_16 = arith.constant 0.000000e+00 : f32
    %18 = vector.broadcast %cst_16 : f32 to vector<6x128xf32>
    %19 = arith.maximumf %17, %18 : vector<6x128xf32>
    %c0_17 = arith.constant 0 : index
    %c0_18 = arith.constant 0 : index
    %20 = vector.load %arg7[%c0_17, %c0_18] : memref<6x128xf32, #tpu.memory_space<vmem>>, vector<6x128xf32>
    tpu.vector_store %arg7[%c0_17, %c0_18], %19 {strides = array<i32>} : memref<6x128xf32, #tpu.memory_space<vmem>>, vector<6x128xf32>,
    return
  }
}

module attributes {stable_mosaic.version = 11 : i64} {
  func.func @kernel(%arg0: memref<54x128xf32, #tpu.memory_space<vmem>>, %arg1: memref<12x54xf32, #tpu.memory_space<vmem>>, %arg2: memref<12x1xf32, #tpu.memory_space<vmem>>, %arg3: memref<12x1xf32, #tpu.memory_space<vmem>>, %arg4: memref<12x128xf32, #tpu.memory_space<vmem>>) attributes {dimension_semantics = [], scalar_prefetch = 0 : i64, scratch_operands = 0 : i64, tpu.core_type = #tpu.core_type<tc>} {
    %c0 = arith.constant 0 : index
    %c0_0 = arith.constant 0 : index
    %0 = vector.load %arg1[%c0, %c0_0] : memref<12x54xf32, #tpu.memory_space<vmem>>, vector<12x54xf32>
    %c0_1 = arith.constant 0 : index
    %c0_2 = arith.constant 0 : index
    %1 = vector.load %arg0[%c0_1, %c0_2] : memref<54x128xf32, #tpu.memory_space<vmem>>, vector<54x128xf32>
    %cst = arith.constant dense<0.000000e+00> : vector<12x128xf32>
    %2 = tpu.matmul %0, %1, %cst {dimension_numbers = #tpu.dot_dimension_numbers<[1], [0], [0], [1], [0, 0, 1, 1], [], []>} : vector<12x54xf32>, vector<54x128xf32>, vector<12x128xf32> -> vector<12x128xf32>
    %c0_3 = arith.constant 0 : index
    %c0_4 = arith.constant 0 : index
    %3 = vector.load %arg2[%c0_3, %c0_4] : memref<12x1xf32, #tpu.memory_space<vmem>>, vector<12x1xf32>
    %4 = vector.broadcast %3 : vector<12x1xf32> to vector<12x128xf32>
    %5 = arith.mulf %2, %4 : vector<12x128xf32>
    %c0_5 = arith.constant 0 : index
    %c0_6 = arith.constant 0 : index
    %6 = vector.load %arg3[%c0_5, %c0_6] : memref<12x1xf32, #tpu.memory_space<vmem>>, vector<12x1xf32>
    %7 = vector.broadcast %6 : vector<12x1xf32> to vector<12x128xf32>
    %8 = arith.addf %5, %7 : vector<12x128xf32>
    %cst_7 = arith.constant 0.000000e+00 : f32
    %9 = vector.broadcast %cst_7 : f32 to vector<12x128xf32>
    %10 = arith.maximumf %8, %9 : vector<12x128xf32>
    %c0_8 = arith.constant 0 : index
    %c0_9 = arith.constant 0 : index
    %11 = vector.load %arg4[%c0_8, %c0_9] : memref<12x128xf32, #tpu.memory_space<vmem>>, vector<12x128xf32>
    tpu.vector_store %arg4[%c0_8, %c0_9], %10 {strides = array<i32>} : memref<12x128xf32, #tpu.memory_space<vmem>>, vector<12x128xf32>,
    return
  }
}

module attributes {stable_mosaic.version = 11 : i64} {
  func.func @kernel(%arg0: memref<108x32xf32, #tpu.memory_space<vmem>>, %arg1: memref<108x32xf32, #tpu.memory_space<vmem>>, %arg2: memref<108x32xf32, #tpu.memory_space<vmem>>, %arg3: memref<108x32xf32, #tpu.memory_space<vmem>>, %arg4: memref<12x108xf32, #tpu.memory_space<vmem>>, %arg5: memref<12x1xf32, #tpu.memory_space<vmem>>, %arg6: memref<12x1xf32, #tpu.memory_space<vmem>>, %arg7: memref<12x32xf32, #tpu.memory_space<vmem>>) attributes {dimension_semantics = [], scalar_prefetch = 0 : i64, scratch_operands = 0 : i64, tpu.core_type = #tpu.core_type<tc>} {
    %c0 = arith.constant 0 : index
    %c0_0 = arith.constant 0 : index
    %0 = vector.load %arg4[%c0, %c0_0] : memref<12x108xf32, #tpu.memory_space<vmem>>, vector<12x108xf32>
    %c0_1 = arith.constant 0 : index
    %c0_2 = arith.constant 0 : index
    %1 = vector.load %arg0[%c0_1, %c0_2] : memref<108x32xf32, #tpu.memory_space<vmem>>, vector<108x32xf32>
    %cst = arith.constant dense<0.000000e+00> : vector<12x32xf32>
    %2 = tpu.matmul %0, %1, %cst {dimension_numbers = #tpu.dot_dimension_numbers<[1], [0], [0], [1], [0, 0, 1, 1], [], []>} : vector<12x108xf32>, vector<108x32xf32>, vector<12x32xf32> -> vector<12x32xf32>
    %c0_3 = arith.constant 0 : index
    %c0_4 = arith.constant 0 : index
    %3 = vector.load %arg1[%c0_3, %c0_4] : memref<108x32xf32, #tpu.memory_space<vmem>>, vector<108x32xf32>
    %cst_5 = arith.constant dense<0.000000e+00> : vector<12x32xf32>
    %4 = tpu.matmul %0, %3, %cst_5 {dimension_numbers = #tpu.dot_dimension_numbers<[1], [0], [0], [1], [0, 0, 1, 1], [], []>} : vector<12x108xf32>, vector<108x32xf32>, vector<12x32xf32> -> vector<12x32xf32>
    %5 = arith.maximumf %2, %4 : vector<12x32xf32>
    %c0_6 = arith.constant 0 : index
    %c0_7 = arith.constant 0 : index
    %6 = vector.load %arg2[%c0_6, %c0_7] : memref<108x32xf32, #tpu.memory_space<vmem>>, vector<108x32xf32>
    %cst_8 = arith.constant dense<0.000000e+00> : vector<12x32xf32>
    %7 = tpu.matmul %0, %6, %cst_8 {dimension_numbers = #tpu.dot_dimension_numbers<[1], [0], [0], [1], [0, 0, 1, 1], [], []>} : vector<12x108xf32>, vector<108x32xf32>, vector<12x32xf32> -> vector<12x32xf32>
    %8 = arith.maximumf %5, %7 : vector<12x32xf32>
    %c0_9 = arith.constant 0 : index
    %c0_10 = arith.constant 0 : index
    %9 = vector.load %arg3[%c0_9, %c0_10] : memref<108x32xf32, #tpu.memory_space<vmem>>, vector<108x32xf32>
    %cst_11 = arith.constant dense<0.000000e+00> : vector<12x32xf32>
    %10 = tpu.matmul %0, %9, %cst_11 {dimension_numbers = #tpu.dot_dimension_numbers<[1], [0], [0], [1], [0, 0, 1, 1], [], []>} : vector<12x108xf32>, vector<108x32xf32>, vector<12x32xf32> -> vector<12x32xf32>
    %11 = arith.maximumf %8, %10 : vector<12x32xf32>
    %c0_12 = arith.constant 0 : index
    %c0_13 = arith.constant 0 : index
    %12 = vector.load %arg5[%c0_12, %c0_13] : memref<12x1xf32, #tpu.memory_space<vmem>>, vector<12x1xf32>
    %13 = vector.broadcast %12 : vector<12x1xf32> to vector<12x32xf32>
    %14 = arith.mulf %11, %13 : vector<12x32xf32>
    %c0_14 = arith.constant 0 : index
    %c0_15 = arith.constant 0 : index
    %15 = vector.load %arg6[%c0_14, %c0_15] : memref<12x1xf32, #tpu.memory_space<vmem>>, vector<12x1xf32>
    %16 = vector.broadcast %15 : vector<12x1xf32> to vector<12x32xf32>
    %17 = arith.addf %14, %16 : vector<12x32xf32>
    %cst_16 = arith.constant 0.000000e+00 : f32
    %18 = vector.broadcast %cst_16 : f32 to vector<12x32xf32>
    %19 = arith.maximumf %17, %18 : vector<12x32xf32>
    %c0_17 = arith.constant 0 : index
    %c0_18 = arith.constant 0 : index
    %20 = vector.load %arg7[%c0_17, %c0_18] : memref<12x32xf32, #tpu.memory_space<vmem>>, vector<12x32xf32>
    tpu.vector_store %arg7[%c0_17, %c0_18], %19 {strides = array<i32>} : memref<12x32xf32, #tpu.memory_space<vmem>>, vector<12x32xf32>,
    return
  }
}

module attributes {stable_mosaic.version = 11 : i64} {
  func.func @kernel(%arg0: memref<108x8xf32, #tpu.memory_space<vmem>>, %arg1: memref<108x8xf32, #tpu.memory_space<vmem>>, %arg2: memref<108x8xf32, #tpu.memory_space<vmem>>, %arg3: memref<108x8xf32, #tpu.memory_space<vmem>>, %arg4: memref<24x108xf32, #tpu.memory_space<vmem>>, %arg5: memref<24x1xf32, #tpu.memory_space<vmem>>, %arg6: memref<24x1xf32, #tpu.memory_space<vmem>>, %arg7: memref<24x8xf32, #tpu.memory_space<vmem>>) attributes {dimension_semantics = [], scalar_prefetch = 0 : i64, scratch_operands = 0 : i64, tpu.core_type = #tpu.core_type<tc>} {
    %c0 = arith.constant 0 : index
    %c0_0 = arith.constant 0 : index
    %0 = vector.load %arg4[%c0, %c0_0] : memref<24x108xf32, #tpu.memory_space<vmem>>, vector<24x108xf32>
    %c0_1 = arith.constant 0 : index
    %c0_2 = arith.constant 0 : index
    %1 = vector.load %arg0[%c0_1, %c0_2] : memref<108x8xf32, #tpu.memory_space<vmem>>, vector<108x8xf32>
    %cst = arith.constant dense<0.000000e+00> : vector<24x8xf32>
    %2 = tpu.matmul %0, %1, %cst {dimension_numbers = #tpu.dot_dimension_numbers<[1], [0], [0], [1], [0, 0, 1, 1], [], []>} : vector<24x108xf32>, vector<108x8xf32>, vector<24x8xf32> -> vector<24x8xf32>
    %c0_3 = arith.constant 0 : index
    %c0_4 = arith.constant 0 : index
    %3 = vector.load %arg1[%c0_3, %c0_4] : memref<108x8xf32, #tpu.memory_space<vmem>>, vector<108x8xf32>
    %cst_5 = arith.constant dense<0.000000e+00> : vector<24x8xf32>
    %4 = tpu.matmul %0, %3, %cst_5 {dimension_numbers = #tpu.dot_dimension_numbers<[1], [0], [0], [1], [0, 0, 1, 1], [], []>} : vector<24x108xf32>, vector<108x8xf32>, vector<24x8xf32> -> vector<24x8xf32>
    %5 = arith.maximumf %2, %4 : vector<24x8xf32>
    %c0_6 = arith.constant 0 : index
    %c0_7 = arith.constant 0 : index
    %6 = vector.load %arg2[%c0_6, %c0_7] : memref<108x8xf32, #tpu.memory_space<vmem>>, vector<108x8xf32>
    %cst_8 = arith.constant dense<0.000000e+00> : vector<24x8xf32>
    %7 = tpu.matmul %0, %6, %cst_8 {dimension_numbers = #tpu.dot_dimension_numbers<[1], [0], [0], [1], [0, 0, 1, 1], [], []>} : vector<24x108xf32>, vector<108x8xf32>, vector<24x8xf32> -> vector<24x8xf32>
    %8 = arith.maximumf %5, %7 : vector<24x8xf32>
    %c0_9 = arith.constant 0 : index
    %c0_10 = arith.constant 0 : index
    %9 = vector.load %arg3[%c0_9, %c0_10] : memref<108x8xf32, #tpu.memory_space<vmem>>, vector<108x8xf32>
    %cst_11 = arith.constant dense<0.000000e+00> : vector<24x8xf32>
    %10 = tpu.matmul %0, %9, %cst_11 {dimension_numbers = #tpu.dot_dimension_numbers<[1], [0], [0], [1], [0, 0, 1, 1], [], []>} : vector<24x108xf32>, vector<108x8xf32>, vector<24x8xf32> -> vector<24x8xf32>
    %11 = arith.maximumf %8, %10 : vector<24x8xf32>
    %c0_12 = arith.constant 0 : index
    %c0_13 = arith.constant 0 : index
    %12 = vector.load %arg5[%c0_12, %c0_13] : memref<24x1xf32, #tpu.memory_space<vmem>>, vector<24x1xf32>
    %13 = vector.broadcast %12 : vector<24x1xf32> to vector<24x8xf32>
    %14 = arith.mulf %11, %13 : vector<24x8xf32>
    %c0_14 = arith.constant 0 : index
    %c0_15 = arith.constant 0 : index
    %15 = vector.load %arg6[%c0_14, %c0_15] : memref<24x1xf32, #tpu.memory_space<vmem>>, vector<24x1xf32>
    %16 = vector.broadcast %15 : vector<24x1xf32> to vector<24x8xf32>
    %17 = arith.addf %14, %16 : vector<24x8xf32>
    %cst_16 = arith.constant 0.000000e+00 : f32
    %18 = vector.broadcast %cst_16 : f32 to vector<24x8xf32>
    %19 = arith.maximumf %17, %18 : vector<24x8xf32>
    %c0_17 = arith.constant 0 : index
    %c0_18 = arith.constant 0 : index
    %20 = vector.load %arg7[%c0_17, %c0_18] : memref<24x8xf32, #tpu.memory_space<vmem>>, vector<24x8xf32>
    tpu.vector_store %arg7[%c0_17, %c0_18], %19 {strides = array<i32>} : memref<24x8xf32, #tpu.memory_space<vmem>>, vector<24x8xf32>,
    return
  }
}

module attributes {stable_mosaic.version = 11 : i64} {
  func.func @kernel(%arg0: memref<8x24xf32, #tpu.memory_space<vmem>>, %arg1: memref<24x100xf32, #tpu.memory_space<vmem>>, %arg2: memref<1x100xf32, #tpu.memory_space<vmem>>, %arg3: memref<8x100xf32, #tpu.memory_space<vmem>>) attributes {dimension_semantics = [], scalar_prefetch = 0 : i64, scratch_operands = 0 : i64, tpu.core_type = #tpu.core_type<tc>} {
    %c0 = arith.constant 0 : index
    %c0_0 = arith.constant 0 : index
    %0 = vector.load %arg0[%c0, %c0_0] : memref<8x24xf32, #tpu.memory_space<vmem>>, vector<8x24xf32>
    %c0_1 = arith.constant 0 : index
    %c0_2 = arith.constant 0 : index
    %1 = vector.load %arg1[%c0_1, %c0_2] : memref<24x100xf32, #tpu.memory_space<vmem>>, vector<24x100xf32>
    %cst = arith.constant dense<0.000000e+00> : vector<8x100xf32>
    %2 = tpu.matmul %0, %1, %cst {dimension_numbers = #tpu.dot_dimension_numbers<[1], [0], [0], [1], [0, 0, 1, 1], [], []>} : vector<8x24xf32>, vector<24x100xf32>, vector<8x100xf32> -> vector<8x100xf32>
    %c0_3 = arith.constant 0 : index
    %c0_4 = arith.constant 0 : index
    %3 = vector.load %arg2[%c0_3, %c0_4] : memref<1x100xf32, #tpu.memory_space<vmem>>, vector<1x100xf32>
    %4 = vector.broadcast %3 : vector<1x100xf32> to vector<8x100xf32>
    %5 = arith.addf %2, %4 : vector<8x100xf32>
    %c0_5 = arith.constant 0 : index
    %c0_6 = arith.constant 0 : index
    %6 = vector.load %arg3[%c0_5, %c0_6] : memref<8x100xf32, #tpu.memory_space<vmem>>, vector<8x100xf32>
    tpu.vector_store %arg3[%c0_5, %c0_6], %5 {strides = array<i32>} : memref<8x100xf32, #tpu.memory_space<vmem>>, vector<8x100xf32>,
    return
  }
}

</mosaic_0001>

<bundles_post_ra>
// kernel: mynet2_forward.8
= control target key start
LH: loop header
LB: loop body
LE: loop exit
PB: predicated region body
PF: predicated region fallthrough
CT: control target
= control target key end

     0   :  { %vm86_vm0 = vcmask 1042432   ;;  %v915_v3 = vmov 0.0   ;;  %v916_v8 = vmov 0   ;;  %vm917_vm1 = vmmov 1   ;;  %s1267_s0 = inlined_call_operand.vmem [shape: f32[27,2048], index: 0, kind: input, shape index: {}]   ;;  %s1268_s1 = inlined_call_operand.vmem [shape: f32[3,27], index: 1, kind: input, shape index: {}]   ;;  %s1269_s2 = inlined_call_operand.vmem [shape: f32[3,1], index: 2, kind: input, shape index: {}]   ;;  %s1270_s3 = inlined_call_operand.vmem [shape: f32[3,1], index: 3, kind: input, shape index: {}]   ;;  %s1271_s4 = inlined_call_operand.vmem [shape: f32[3,2048], index: 4, kind: output, shape index: {}]  }
   0x1   :  { %v19_v0 = vld [vmem:[%s1267_s0 + $0x8] sm:$0xff]  ;;  %v21_v2 = vld [vmem:[%s1267_s0 + $0x18] sm:$0xff]  ;;  %199 = vmatprep.mubr.f32.mxu0 %v915_v3  ;;  %270 = vmatprep.mubr.f32.mxu1 %v915_v3  ;;  %v18_v6 = vld [vmem:[%s1267_s0] sm:$0xff]  ;;  %vm82_vm3 = vcmask 220160  }
   0x2   :  { %v35_v1 = vld [vmem:[%s1267_s0 + $0x88] sm:$0xff]  ;;  %v37_v5 = vld [vmem:[%s1267_s0 + $0x98] sm:$0xff]  ;;  %v34_v7 = vld [vmem:[%s1267_s0 + $0x80] sm:$0xff]  ;;  %914 = vset.pattern.permute.xlu0 %v916_v8 }
   0x3   :  { %v831_v4 = vpack.c.bf16 %v35_v1, %v19_v0  ;;  %v841_v9 = vpack.c.bf16 %v37_v5, %v21_v2  ;;  %v833_v10 = vpack.c.bf16 %v34_v7, %v18_v6  ;;  %v20_v11 = vld [vmem:[%s1267_s0 + $0x10] sm:$0xff]  ;;  %v51_v13 = vld [vmem:[%s1267_s0 + $0x108] sm:$0xff]  ;;  %vm976_vm2 = vmpackc.low %vm86_vm0, %vm917_vm1 }
   0x4   :  { %v36_v12 = vld [vmem:[%s1267_s0 + $0x90] sm:$0xff]  ;;  %v67_v15 = vld [vmem:[%s1267_s0 + $0x188] sm:$0x7]  ;;  %v53_v17 = vld [vmem:[%s1267_s0 + $0x118] sm:$0xff] }
   0x5   :  { %832 = vmatprep.subr.bf16.mxu0 %v831_v4  ;;  %v843_v14 = vpack.c.bf16 %v36_v12, %v20_v11  ;;  %842 = vmatprep.subr.bf16.mxu1 %v841_v9  ;;  %v835_v18 = vpack.c.bf16 %v67_v15, %v51_v13  ;;  %v69_v19 = vld [vmem:[%s1267_s0 + $0x198] sm:$0x7]  ;;  %v50_v20 = vld [vmem:[%s1267_s0 + $0x100] sm:$0xff]  ;;  %v52_v24 = vld [vmem:[%s1267_s0 + $0x110] sm:$0xff] }
   0x6   :  { %834 = vmatpush1.bf16.msra.mxu0 %v833_v10  ;;  %v66_v21 = vld [vmem:[%s1267_s0 + $0x180] sm:$0x7]  ;;  %v845_v22 = vpack.c.bf16 %v69_v19, %v53_v17  ;;  %v68_v25 = vld [vmem:[%s1267_s0 + $0x190] sm:$0x7]  ;;  %v23_v28 = vld [vmem:[%s1267_s0 + $0x28] sm:$0xff] }
   0x7   :  { %844 = vmatpush1.bf16.msra.mxu1 %v843_v14  ;;  %v838_v23 = vpack.c.bf16 %v66_v21, %v50_v20  ;;  %837 = vmatprep.subr.msk.bf16.mxu0 %vm976_vm2, %v835_v18  ;;  %v848_v26 = vpack.c.bf16 %v68_v25, %v52_v24  ;;  %v1003_v27 = vld [vmem:[%s1268_s1] sm:$0x7]  ;;  %v39_v29 = vld [vmem:[%s1267_s0 + $0xa8] sm:$0xff]  ;;  %v25_v30 = vld [vmem:[%s1267_s0 + $0x38] sm:$0xff] }
   0x8   :  { %847 = vmatprep.subr.msk.bf16.mxu1 %vm976_vm2, %v845_v22  ;;  %v851_v31 = vpack.c.bf16 %v39_v29, %v23_v28  ;;  %v41_v32 = vld [vmem:[%s1267_s0 + $0xb8] sm:$0xff]  ;;  %v22_v33 = vld [vmem:[%s1267_s0 + $0x20] sm:$0xff]  ;;  %v24_v37 = vld [vmem:[%s1267_s0 + $0x30] sm:$0xff] }
   0x9   :  { %v38_v34 = vld [vmem:[%s1267_s0 + $0xa0] sm:$0xff]  ;;  %v861_v35 = vpack.c.bf16 %v41_v32, %v25_v30  ;;  %v40_v38 = vld [vmem:[%s1267_s0 + $0xb0] sm:$0xff]  ;;  %v55_v39 = vld [vmem:[%s1267_s0 + $0x128] sm:$0xff] }
   0xa   :  { %840 = vmatpush1.bf16.msk.msra.mxu0 %vm976_vm2, %v838_v23  ;;  %v853_v36 = vpack.c.bf16 %v38_v34, %v22_v33  ;;  %v863_v40 = vpack.c.bf16 %v40_v38, %v24_v37  ;;  %v71_v41 = vld [vmem:[%s1267_s0 + $0x1a8] sm:$0x7]  ;;  %v57_v42 = vld [vmem:[%s1267_s0 + $0x138] sm:$0xff]  ;;  %v54_v46 = vld [vmem:[%s1267_s0 + $0x120] sm:$0xff] }
   0xb   :  { %850 = vmatpush1.bf16.msk.msra.mxu1 %vm976_vm2, %v848_v26  ;;  %852 = vmatprep.subr.bf16.mxu0 %v851_v31  ;;  %v73_v43 = vld [vmem:[%s1267_s0 + $0x1b8] sm:$0x7]  ;;  %v855_v44 = vpack.c.bf16 %v71_v41, %v55_v39  ;;  %v70_v47 = vld [vmem:[%s1267_s0 + $0x1a0] sm:$0x7]  ;;  %v56_v48 = vld [vmem:[%s1267_s0 + $0x130] sm:$0xff] }
   0xc   :  { %862 = vmatprep.subr.bf16.mxu1 %v861_v35  ;;  %v865_v45 = vpack.c.bf16 %v73_v43, %v57_v42  ;;  %v72_v49 = vld [vmem:[%s1267_s0 + $0x1b0] sm:$0x7]  ;;  %v27_v50 = vld [vmem:[%s1267_s0 + $0x48] sm:$0xff]  ;;  %v858_v52 = vpack.c.bf16 %v70_v47, %v54_v46  ;;  %v29_v53 = vld [vmem:[%s1267_s0 + $0x58] sm:$0xff] }
   0xd   :  { %809 = vmatmul.mubr.msk.f32.vlgmr.msra.gmra.mrb[0].mxu0 %vm82_vm3, %v1003_v27  ;;  %v43_v51 = vld [vmem:[%s1267_s0 + $0xc8] sm:$0xff]  ;;  %v45_v54 = vld [vmem:[%s1267_s0 + $0xd8] sm:$0xff]  ;;  %v868_v55 = vpack.c.bf16 %v72_v49, %v56_v48  ;;  %v26_v57 = vld [vmem:[%s1267_s0 + $0x40] sm:$0xff] }
   0xe   :  { %812 = vmatmul.mubr.msk.f32.vlgmr.msra.gmra.mrb[0].mxu1 %vm82_vm3, %v1003_v27  ;;  %854 = vmatpush1.bf16.msra.mxu0 %v853_v36  ;;  %v871_v56 = vpack.c.bf16 %v43_v51, %v27_v50  ;;  %v42_v58 = vld [vmem:[%s1267_s0 + $0xc0] sm:$0xff]  ;;  %v28_v59 = vld [vmem:[%s1267_s0 + $0x50] sm:$0xff]  ;;  %v881_v60 = vpack.c.bf16 %v45_v54, %v29_v53  ;;  %v59_v62 = vld [vmem:[%s1267_s0 + $0x148] sm:$0xff] }
   0xf   :  { %864 = vmatpush1.bf16.msra.mxu1 %v863_v40  ;;  %857 = vmatprep.subr.msk.bf16.mxu0 %vm976_vm2, %v855_v44  ;;  %v44_v61 = vld [vmem:[%s1267_s0 + $0xd0] sm:$0xff]  ;;  %v75_v63 = vld [vmem:[%s1267_s0 + $0x1c8] sm:$0x7]  ;;  %v61_v0 = vld [vmem:[%s1267_s0 + $0x158] sm:$0xff]  ;;  %v873_v2 = vpack.c.bf16 %v42_v58, %v26_v57 }
  0x10   :  { %867 = vmatprep.subr.msk.bf16.mxu1 %vm976_vm2, %v865_v45  ;;  %341 = vmatprep.mubr.f32.mxu0 %v915_v3  ;;  %v77_v1 = vld [vmem:[%s1267_s0 + $0x1d8] sm:$0x7]  ;;  %v883_v4 = vpack.c.bf16 %v44_v61, %v28_v59  ;;  %v875_v5 = vpack.c.bf16 %v75_v63, %v59_v62  ;;  %v58_v6 = vld [vmem:[%s1267_s0 + $0x140] sm:$0xff]  ;;  %v60_v8 = vld [vmem:[%s1267_s0 + $0x150] sm:$0xff] }
  0x11   :  { %412 = vmatprep.mubr.f32.mxu1 %v915_v3  ;;  %v74_v7 = vld [vmem:[%s1267_s0 + $0x1c0] sm:$0x7]  ;;  %v885_v9 = vpack.c.bf16 %v77_v1, %v61_v0  ;;  %v76_v10 = vld [vmem:[%s1267_s0 + $0x1d0] sm:$0x7]  ;;  %v31_v11 = vld [vmem:[%s1267_s0 + $0x68] sm:$0xff] }
  0x12   :  { %860 = vmatpush1.bf16.msk.msra.mxu0 %vm976_vm2, %v858_v52  ;;  %v47_v12 = vld [vmem:[%s1267_s0 + $0xe8] sm:$0xff]  ;;  %v33_v13 = vld [vmem:[%s1267_s0 + $0x78] sm:$0xff]  ;;  %v878_v15 = vpack.c.bf16 %v74_v7, %v58_v6  ;;  %v30_v17 = vld [vmem:[%s1267_s0 + $0x60] sm:$0xff]  ;;  %v888_v18 = vpack.c.bf16 %v76_v10, %v60_v8 }
  0x13   :  { %870 = vmatpush1.bf16.msk.msra.mxu1 %vm976_vm2, %v868_v55  ;;  %872 = vmatprep.subr.bf16.mxu0 %v871_v56  ;;  %v49_v14 = vld [vmem:[%s1267_s0 + $0xf8] sm:$0xff]  ;;  %v891_v19 = vpack.c.bf16 %v47_v12, %v31_v11  ;;  %v46_v20 = vld [vmem:[%s1267_s0 + $0xe0] sm:$0xff]  ;;  %v32_v21 = vld [vmem:[%s1267_s0 + $0x70] sm:$0xff] }
  0x14   :  { %882 = vmatprep.subr.bf16.mxu1 %v881_v60  ;;  %v48_v22 = vld [vmem:[%s1267_s0 + $0xf0] sm:$0xff]  ;;  %v901_v23 = vpack.c.bf16 %v49_v14, %v33_v13  ;;  %v63_v24 = vld [vmem:[%s1267_s0 + $0x168] sm:$0xff]  ;;  %v703_v26 = vld [vmem:[%s1269_s2] sm:$0x7]  ;;  %v893_v30 = vpack.c.bf16 %v46_v20, %v30_v17 }
  0x15   :  { %815 = vmatmul.mubr.msk.f32.vlgmr.msra.gmra.mrb[2].mxu0 %vm82_vm3, %v1003_v27  ;;  %v79_v25 = vld [vmem:[%s1267_s0 + $0x1e8] sm:$0x7]  ;;  %v65_v28 = vld [vmem:[%s1267_s0 + $0x178] sm:$0xff]  ;;  %706 = vperm.xlu0 %914, %v703_v26   ;;  %v725_v31 = vld [vmem:[%s1270_s3] sm:$0x7]  ;;  %v903_v32 = vpack.c.bf16 %v48_v22, %v32_v21 }
  0x16   :  { %818 = vmatmul.mubr.msk.f32.vlgmr.msra.gmra.mrb[2].mxu1 %vm82_vm3, %v1003_v27  ;;  %874 = vmatpush1.bf16.msra.mxu0 %v873_v2  ;;  %v81_v29 = vld [vmem:[%s1267_s0 + $0x1f8] sm:$0x7]  ;;  %v895_v33 = vpack.c.bf16 %v79_v25, %v63_v24  ;;  %v62_v34 = vld [vmem:[%s1267_s0 + $0x160] sm:$0xff]  ;;  %v64_v37 = vld [vmem:[%s1267_s0 + $0x170] sm:$0xff] }
  0x17   :  { %884 = vmatpush1.bf16.msra.mxu1 %v883_v4  ;;  %877 = vmatprep.subr.msk.bf16.mxu0 %vm976_vm2, %v875_v5  ;;  %v78_v35 = vld [vmem:[%s1267_s0 + $0x1e0] sm:$0x7]  ;;  %v905_v36 = vpack.c.bf16 %v81_v29, %v65_v28  ;;  %v80_v38 = vld [vmem:[%s1267_s0 + $0x1f0] sm:$0x7] }
  0x18   :  { %887 = vmatprep.subr.msk.bf16.mxu1 %vm976_vm2, %v885_v9  ;;  %483 = vmatprep.mubr.f32.mxu0 %v915_v3  ;;  %v898_v39 = vpack.c.bf16 %v78_v35, %v62_v34  ;;  %v908_v40 = vpack.c.bf16 %v80_v38, %v64_v37 }
  0x19   :  { %554 = vmatprep.mubr.f32.mxu1 %v915_v3  ;;  %728 = vperm.xlu0 %914, %v725_v31  }
  0x1a   :  { %880 = vmatpush1.bf16.msk.msra.mxu0 %vm976_vm2, %v878_v15 }
  0x1b   :  { %890 = vmatpush1.bf16.msk.msra.mxu1 %vm976_vm2, %v888_v18  ;;  %892 = vmatprep.subr.bf16.mxu0 %v891_v19 }
  0x1c   :  { %902 = vmatprep.subr.bf16.mxu1 %v901_v23 }
  0x1d   :  { %821 = vmatmul.mubr.msk.f32.vlgmr.msra.gmra.mrb[4].mxu0 %vm82_vm3, %v1003_v27 }
  0x1e   :  { %824 = vmatmul.mubr.msk.f32.vlgmr.msra.gmra.mrb[4].mxu1 %vm82_vm3, %v1003_v27  ;;  %894 = vmatpush1.bf16.msra.mxu0 %v893_v30 }
  0x1f   :  { %904 = vmatpush1.bf16.msra.mxu1 %v903_v32  ;;  %897 = vmatprep.subr.msk.bf16.mxu0 %vm976_vm2, %v895_v33 }
  0x20   :  { %907 = vmatprep.subr.msk.bf16.mxu1 %vm976_vm2, %v905_v36  ;;  %625 = vmatprep.mubr.f32.mxu0 %v915_v3 }
  0x21   :  { %696 = vmatprep.mubr.f32.mxu1 %v915_v3 }
  0x22   :  { %900 = vmatpush1.bf16.msk.msra.mxu0 %vm976_vm2, %v898_v39 }
  0x23   :  { %910 = vmatpush1.bf16.msk.msra.mxu1 %vm976_vm2, %v908_v40 }
  0x25   :  { %827 = vmatmul.mubr.msk.f32.vlgmr.msra.gmra.mrb[6].mxu0 %vm82_vm3, %v1003_v27 }
  0x26   :  { %830 = vmatmul.mubr.msk.f32.vlgmr.msra.gmra.mrb[6].mxu1 %vm82_vm3, %v1003_v27 }
  0x94   :  { %v1207_v41 = vpop.permute.xlu0 %706 }
  0x98   :  { %v1209_v43 = vpop.permute.xlu0 %728 }
  0xe0   :  { %v201_v42 = vpop.f32.mrb[0].mxu0 }
  0xe1   :  { %v709_v44 = vmul.f32 %v1207_v41, %v201_v42  ;;  %v272_v3 = vpop.f32.mrb[0].mxu1  ;;  %v203_v45 = vpop.f32.mrb[1].mxu0 }
  0xe2   :  { %v711_v46 = vmul.f32 %v1207_v41, %v272_v3  ;;  %v710_v16 = vmul.f32 %v1207_v41, %v203_v45  ;;  %v274_v47 = vpop.f32.mrb[1].mxu1 }
  0xe3   :  { %v712_v48 = vmul.f32 %v1207_v41, %v274_v47  ;;  %v731_v49 = vadd.f32 %v1209_v43, %v709_v44 }
  0xe4   :  { %v732_v27 = vadd.f32 %v1209_v43, %v710_v16  ;;  %v733_v50 = vadd.f32 %v1209_v43, %v711_v46 }
  0xe5   :  { %v734_v51 = vadd.f32 %v1209_v43, %v712_v48  ;;  %v747_v52 = vmax.f32 %v731_v49, 0.0 }
  0xe6   :  { %v748_v53 = vmax.f32 %v732_v27, 0.0  ;;  %v749_v54 = vmax.f32 %v733_v50, 0.0 }
  0xe7   :  { %v750_v55 = vmax.f32 %v734_v51, 0.0 }
  0xe8   :  { %v343_v56 = vpop.f32.mrb[2].mxu0  ;;  %v779_v57 = vcombine.low %v747_v52, %v748_v53 }
  0xe9   :  { %v713_v58 = vmul.f32 %v1207_v41, %v343_v56  ;;  %v414_v59 = vpop.f32.mrb[2].mxu1  ;;  %v345_v60 = vpop.f32.mrb[3].mxu0  ;;  %v780_v61 = vcombine.low %v749_v54, %v750_v55 }
  0xea   :  { %v715_v62 = vmul.f32 %v1207_v41, %v414_v59  ;;  %v714_v63 = vmul.f32 %v1207_v41, %v345_v60  ;;  %795 = vst [vmem:[%s1271_s4] sm:$0x77] %v779_v57  ;;  %v416_v0 = vpop.f32.mrb[3].mxu1 }
  0xeb   :  { %v735_v1 = vadd.f32 %v1209_v43, %v713_v58  ;;  %796 = vst [vmem:[%s1271_s4 + $0x8] sm:$0x77] %v780_v61  ;;  %v716_v2 = vmul.f32 %v1207_v41, %v416_v0 }
  0xec   :  { %v737_v4 = vadd.f32 %v1209_v43, %v715_v62  ;;  %v736_v5 = vadd.f32 %v1209_v43, %v714_v63 }
  0xed   :  { %v751_v6 = vmax.f32 %v735_v1, 0.0  ;;  %v738_v7 = vadd.f32 %v1209_v43, %v716_v2 }
  0xee   :  { %v753_v8 = vmax.f32 %v737_v4, 0.0  ;;  %v752_v9 = vmax.f32 %v736_v5, 0.0 }
  0xef   :  { %v754_v10 = vmax.f32 %v738_v7, 0.0 }
  0xf0   :  { %v781_v11 = vcombine.low %v751_v6, %v752_v9  ;;  %v485_v12 = vpop.f32.mrb[4].mxu0 }
  0xf1   :  { %v782_v13 = vcombine.low %v753_v8, %v754_v10  ;;  %v717_v14 = vmul.f32 %v1207_v41, %v485_v12  ;;  %v556_v15 = vpop.f32.mrb[4].mxu1  ;;  %v487_v17 = vpop.f32.mrb[5].mxu0 }
  0xf2   :  { %797 = vst [vmem:[%s1271_s4 + $0x10] sm:$0x77] %v781_v11  ;;  %v719_v18 = vmul.f32 %v1207_v41, %v556_v15  ;;  %v718_v19 = vmul.f32 %v1207_v41, %v487_v17  ;;  %v558_v20 = vpop.f32.mrb[5].mxu1 }
  0xf3   :  { %798 = vst [vmem:[%s1271_s4 + $0x18] sm:$0x77] %v782_v13  ;;  %v739_v21 = vadd.f32 %v1209_v43, %v717_v14  ;;  %v720_v22 = vmul.f32 %v1207_v41, %v558_v20 }
  0xf4   :  { %v741_v23 = vadd.f32 %v1209_v43, %v719_v18  ;;  %v740_v24 = vadd.f32 %v1209_v43, %v718_v19 }
  0xf5   :  { %v755_v25 = vmax.f32 %v739_v21, 0.0  ;;  %v742_v26 = vadd.f32 %v1209_v43, %v720_v22 }
  0xf6   :  { %v757_v28 = vmax.f32 %v741_v23, 0.0  ;;  %v756_v29 = vmax.f32 %v740_v24, 0.0 }
  0xf7   :  { %v758_v30 = vmax.f32 %v742_v26, 0.0 }
  0xf8   :  { %v783_v31 = vcombine.low %v755_v25, %v756_v29  ;;  %v627_v32 = vpop.f32.mrb[6].mxu0 }
  0xf9   :  { %v784_v33 = vcombine.low %v757_v28, %v758_v30  ;;  %v721_v34 = vmul.f32 %v1207_v41, %v627_v32  ;;  %v698_v35 = vpop.f32.mrb[6].mxu1  ;;  %v629_v36 = vpop.f32.mrb[7].mxu0 }
  0xfa   :  { %799 = vst [vmem:[%s1271_s4 + $0x20] sm:$0x77] %v783_v31  ;;  %v723_v37 = vmul.f32 %v1207_v41, %v698_v35  ;;  %v722_v38 = vmul.f32 %v1207_v41, %v629_v36  ;;  %v700_v39 = vpop.f32.mrb[7].mxu1 }
  0xfb   :  { %800 = vst [vmem:[%s1271_s4 + $0x28] sm:$0x77] %v784_v33  ;;  %v743_v40 = vadd.f32 %v1209_v43, %v721_v34  ;;  %v724_v42 = vmul.f32 %v1207_v41, %v700_v39 }
  0xfc   :  { %v745_v44 = vadd.f32 %v1209_v43, %v723_v37  ;;  %v744_v3 = vadd.f32 %v1209_v43, %v722_v38 }
  0xfd   :  { %v759_v45 = vmax.f32 %v743_v40, 0.0  ;;  %v746_v46 = vadd.f32 %v1209_v43, %v724_v42 }
  0xfe   :  { %v761_v16 = vmax.f32 %v745_v44, 0.0  ;;  %v760_v47 = vmax.f32 %v744_v3, 0.0 }
  0xff   :  { %v762_v48 = vmax.f32 %v746_v46, 0.0 }
 0x100   :  { %v785_v49 = vcombine.low %v759_v45, %v760_v47 }
 0x101   :  { %v786_v27 = vcombine.low %v761_v16, %v762_v48 }
 0x102   :  { %801 = vst [vmem:[%s1271_s4 + $0x30] sm:$0x77] %v785_v49 }
 0x103   :  { %802 = vst [vmem:[%s1271_s4 + $0x38] sm:$0x77] %v786_v27 }

// kernel: mynet2_forward.9
= control target key start
LH: loop header
LB: loop body
LE: loop exit
PB: predicated region body
PF: predicated region fallthrough
CT: control target
= control target key end

     0   :  { %vm47_vm0 = vcmask 1042432   ;;  %v870_v3 = vmov 0.0   ;;  %v871_v8 = vmov 0   ;;  %vm872_vm1 = vmmov 1   ;;  %s1183_s0 = inlined_call_operand.vmem [shape: f32[27,512], index: 0, kind: input, shape index: {}]   ;;  %s1184_s4 = inlined_call_operand.vmem [shape: f32[3,27], index: 4, kind: input, shape index: {}]   ;;  %s1185_s1 = inlined_call_operand.vmem [shape: f32[27,512], index: 1, kind: input, shape index: {}]   ;;  %s1186_s2 = inlined_call_operand.vmem [shape: f32[27,512], index: 2, kind: input, shape index: {}]   ;;  %s1187_s3 = inlined_call_operand.vmem [shape: f32[27,512], index: 3, kind: input, shape index: {}]   ;;  %s1188_s5 = inlined_call_operand.vmem [shape: f32[3,1], index: 5, kind: input, shape index: {}]   ;;  %s1189_s6 = inlined_call_operand.vmem [shape: f32[3,1], index: 6, kind: input, shape index: {}]   ;;  %s1190_s7 = inlined_call_operand.vmem [shape: f32[3,512], index: 7, kind: output, shape index: {}]  }
   0x1   :  { %v28_v0 = vld [vmem:[%s1183_s0 + $0x8] sm:$0xff]  ;;  %v30_v2 = vld [vmem:[%s1183_s0 + $0x18] sm:$0xff]  ;;  %124 = vmatprep.mubr.f32.mxu0 %v870_v3  ;;  %195 = vmatprep.mubr.f32.mxu1 %v870_v3  ;;  %v27_v6 = vld [vmem:[%s1183_s0] sm:$0xff]  ;;  %vm43_vm3 = vcmask 220160  }
   0x2   :  { %v32_v1 = vld [vmem:[%s1183_s0 + $0x28] sm:$0xff]  ;;  %v34_v5 = vld [vmem:[%s1183_s0 + $0x38] sm:$0xff]  ;;  %v31_v7 = vld [vmem:[%s1183_s0 + $0x20] sm:$0xff]  ;;  %869 = vset.pattern.permute.xlu0 %v871_v8 }
   0x3   :  { %v786_v4 = vpack.c.bf16 %v32_v1, %v28_v0  ;;  %v796_v9 = vpack.c.bf16 %v34_v5, %v30_v2  ;;  %v788_v10 = vpack.c.bf16 %v31_v7, %v27_v6  ;;  %v29_v11 = vld [vmem:[%s1183_s0 + $0x10] sm:$0xff]  ;;  %v36_v13 = vld [vmem:[%s1183_s0 + $0x48] sm:$0xff]  ;;  %vm946_vm2 = vmpackc.low %vm47_vm0, %vm872_vm1 }
   0x4   :  { %v33_v12 = vld [vmem:[%s1183_s0 + $0x30] sm:$0xff]  ;;  %v40_v15 = vld [vmem:[%s1183_s0 + $0x68] sm:$0x7]  ;;  %v38_v17 = vld [vmem:[%s1183_s0 + $0x58] sm:$0xff] }
   0x5   :  { %787 = vmatprep.subr.bf16.mxu0 %v786_v4  ;;  %v798_v14 = vpack.c.bf16 %v33_v12, %v29_v11  ;;  %797 = vmatprep.subr.bf16.mxu1 %v796_v9  ;;  %v790_v18 = vpack.c.bf16 %v40_v15, %v36_v13  ;;  %v42_v19 = vld [vmem:[%s1183_s0 + $0x78] sm:$0x7]  ;;  %v35_v20 = vld [vmem:[%s1183_s0 + $0x40] sm:$0xff]  ;;  %v37_v24 = vld [vmem:[%s1183_s0 + $0x50] sm:$0xff] }
   0x6   :  { %789 = vmatpush1.bf16.msra.mxu0 %v788_v10  ;;  %v39_v21 = vld [vmem:[%s1183_s0 + $0x60] sm:$0x7]  ;;  %v800_v22 = vpack.c.bf16 %v42_v19, %v38_v17  ;;  %v41_v25 = vld [vmem:[%s1183_s0 + $0x70] sm:$0x7]  ;;  %v203_v28 = vld [vmem:[%s1185_s1 + $0x8] sm:$0xff] }
   0x7   :  { %799 = vmatpush1.bf16.msra.mxu1 %v798_v14  ;;  %v793_v23 = vpack.c.bf16 %v39_v21, %v35_v20  ;;  %792 = vmatprep.subr.msk.bf16.mxu0 %vm946_vm2, %v790_v18  ;;  %v803_v26 = vpack.c.bf16 %v41_v25, %v37_v24  ;;  %v973_v27 = vld [vmem:[%s1184_s4] sm:$0x7]  ;;  %v207_v29 = vld [vmem:[%s1185_s1 + $0x28] sm:$0xff]  ;;  %v205_v30 = vld [vmem:[%s1185_s1 + $0x18] sm:$0xff] }
   0x8   :  { %802 = vmatprep.subr.msk.bf16.mxu1 %vm946_vm2, %v800_v22  ;;  %v806_v31 = vpack.c.bf16 %v207_v29, %v203_v28  ;;  %v209_v32 = vld [vmem:[%s1185_s1 + $0x38] sm:$0xff]  ;;  %v202_v33 = vld [vmem:[%s1185_s1] sm:$0xff]  ;;  %v204_v37 = vld [vmem:[%s1185_s1 + $0x10] sm:$0xff] }
   0x9   :  { %v206_v34 = vld [vmem:[%s1185_s1 + $0x20] sm:$0xff]  ;;  %v816_v35 = vpack.c.bf16 %v209_v32, %v205_v30  ;;  %v208_v38 = vld [vmem:[%s1185_s1 + $0x30] sm:$0xff]  ;;  %v211_v39 = vld [vmem:[%s1185_s1 + $0x48] sm:$0xff] }
   0xa   :  { %795 = vmatpush1.bf16.msk.msra.mxu0 %vm946_vm2, %v793_v23  ;;  %v808_v36 = vpack.c.bf16 %v206_v34, %v202_v33  ;;  %v818_v40 = vpack.c.bf16 %v208_v38, %v204_v37  ;;  %v215_v41 = vld [vmem:[%s1185_s1 + $0x68] sm:$0x7]  ;;  %v213_v42 = vld [vmem:[%s1185_s1 + $0x58] sm:$0xff]  ;;  %v210_v46 = vld [vmem:[%s1185_s1 + $0x40] sm:$0xff] }
   0xb   :  { %805 = vmatpush1.bf16.msk.msra.mxu1 %vm946_vm2, %v803_v26  ;;  %807 = vmatprep.subr.bf16.mxu0 %v806_v31  ;;  %v217_v43 = vld [vmem:[%s1185_s1 + $0x78] sm:$0x7]  ;;  %v810_v44 = vpack.c.bf16 %v215_v41, %v211_v39  ;;  %v214_v47 = vld [vmem:[%s1185_s1 + $0x60] sm:$0x7]  ;;  %v212_v48 = vld [vmem:[%s1185_s1 + $0x50] sm:$0xff] }
   0xc   :  { %817 = vmatprep.subr.bf16.mxu1 %v816_v35  ;;  %v820_v45 = vpack.c.bf16 %v217_v43, %v213_v42  ;;  %v216_v49 = vld [vmem:[%s1185_s1 + $0x70] sm:$0x7]  ;;  %v377_v50 = vld [vmem:[%s1186_s2 + $0x8] sm:$0xff]  ;;  %v813_v52 = vpack.c.bf16 %v214_v47, %v210_v46  ;;  %v379_v53 = vld [vmem:[%s1186_s2 + $0x18] sm:$0xff] }
   0xd   :  { %764 = vmatmul.mubr.msk.f32.vlgmr.msra.gmra.mrb[0].mxu0 %vm43_vm3, %v973_v27  ;;  %v381_v51 = vld [vmem:[%s1186_s2 + $0x28] sm:$0xff]  ;;  %v383_v54 = vld [vmem:[%s1186_s2 + $0x38] sm:$0xff]  ;;  %v823_v55 = vpack.c.bf16 %v216_v49, %v212_v48  ;;  %v376_v57 = vld [vmem:[%s1186_s2] sm:$0xff] }
   0xe   :  { %767 = vmatmul.mubr.msk.f32.vlgmr.msra.gmra.mrb[0].mxu1 %vm43_vm3, %v973_v27  ;;  %809 = vmatpush1.bf16.msra.mxu0 %v808_v36  ;;  %v826_v56 = vpack.c.bf16 %v381_v51, %v377_v50  ;;  %v380_v58 = vld [vmem:[%s1186_s2 + $0x20] sm:$0xff]  ;;  %v378_v59 = vld [vmem:[%s1186_s2 + $0x10] sm:$0xff]  ;;  %v836_v60 = vpack.c.bf16 %v383_v54, %v379_v53  ;;  %v385_v62 = vld [vmem:[%s1186_s2 + $0x48] sm:$0xff] }
   0xf   :  { %819 = vmatpush1.bf16.msra.mxu1 %v818_v40  ;;  %812 = vmatprep.subr.msk.bf16.mxu0 %vm946_vm2, %v810_v44  ;;  %v382_v61 = vld [vmem:[%s1186_s2 + $0x30] sm:$0xff]  ;;  %v389_v63 = vld [vmem:[%s1186_s2 + $0x68] sm:$0x7]  ;;  %v387_v0 = vld [vmem:[%s1186_s2 + $0x58] sm:$0xff]  ;;  %v828_v2 = vpack.c.bf16 %v380_v58, %v376_v57 }
  0x10   :  { %822 = vmatprep.subr.msk.bf16.mxu1 %vm946_vm2, %v820_v45  ;;  %294 = vmatprep.mubr.f32.mxu0 %v870_v3  ;;  %v391_v1 = vld [vmem:[%s1186_s2 + $0x78] sm:$0x7]  ;;  %v838_v4 = vpack.c.bf16 %v382_v61, %v378_v59  ;;  %v830_v5 = vpack.c.bf16 %v389_v63, %v385_v62  ;;  %v384_v6 = vld [vmem:[%s1186_s2 + $0x40] sm:$0xff]  ;;  %v386_v8 = vld [vmem:[%s1186_s2 + $0x50] sm:$0xff] }
  0x11   :  { %365 = vmatprep.mubr.f32.mxu1 %v870_v3  ;;  %v388_v7 = vld [vmem:[%s1186_s2 + $0x60] sm:$0x7]  ;;  %v840_v9 = vpack.c.bf16 %v391_v1, %v387_v0  ;;  %v390_v10 = vld [vmem:[%s1186_s2 + $0x70] sm:$0x7]  ;;  %v551_v11 = vld [vmem:[%s1187_s3 + $0x8] sm:$0xff] }
  0x12   :  { %815 = vmatpush1.bf16.msk.msra.mxu0 %vm946_vm2, %v813_v52  ;;  %v555_v12 = vld [vmem:[%s1187_s3 + $0x28] sm:$0xff]  ;;  %v553_v13 = vld [vmem:[%s1187_s3 + $0x18] sm:$0xff]  ;;  %v833_v15 = vpack.c.bf16 %v388_v7, %v384_v6  ;;  %v550_v17 = vld [vmem:[%s1187_s3] sm:$0xff]  ;;  %v843_v18 = vpack.c.bf16 %v390_v10, %v386_v8 }
  0x13   :  { %825 = vmatpush1.bf16.msk.msra.mxu1 %vm946_vm2, %v823_v55  ;;  %827 = vmatprep.subr.bf16.mxu0 %v826_v56  ;;  %v557_v14 = vld [vmem:[%s1187_s3 + $0x38] sm:$0xff]  ;;  %v846_v19 = vpack.c.bf16 %v555_v12, %v551_v11  ;;  %v554_v20 = vld [vmem:[%s1187_s3 + $0x20] sm:$0xff]  ;;  %v552_v21 = vld [vmem:[%s1187_s3 + $0x10] sm:$0xff] }
  0x14   :  { %837 = vmatprep.subr.bf16.mxu1 %v836_v60  ;;  %v556_v22 = vld [vmem:[%s1187_s3 + $0x30] sm:$0xff]  ;;  %v856_v23 = vpack.c.bf16 %v557_v14, %v553_v13  ;;  %v559_v24 = vld [vmem:[%s1187_s3 + $0x48] sm:$0xff]  ;;  %v724_v26 = vld [vmem:[%s1188_s5] sm:$0x7]  ;;  %v848_v30 = vpack.c.bf16 %v554_v20, %v550_v17 }
  0x15   :  { %770 = vmatmul.mubr.msk.f32.vlgmr.msra.gmra.mrb[2].mxu0 %vm43_vm3, %v973_v27  ;;  %v563_v25 = vld [vmem:[%s1187_s3 + $0x68] sm:$0x7]  ;;  %v561_v28 = vld [vmem:[%s1187_s3 + $0x58] sm:$0xff]  ;;  %727 = vperm.xlu0 %869, %v724_v26   ;;  %v734_v31 = vld [vmem:[%s1189_s6] sm:$0x7]  ;;  %v858_v32 = vpack.c.bf16 %v556_v22, %v552_v21 }
  0x16   :  { %773 = vmatmul.mubr.msk.f32.vlgmr.msra.gmra.mrb[2].mxu1 %vm43_vm3, %v973_v27  ;;  %829 = vmatpush1.bf16.msra.mxu0 %v828_v2  ;;  %v565_v29 = vld [vmem:[%s1187_s3 + $0x78] sm:$0x7]  ;;  %v850_v33 = vpack.c.bf16 %v563_v25, %v559_v24  ;;  %v558_v34 = vld [vmem:[%s1187_s3 + $0x40] sm:$0xff]  ;;  %v560_v37 = vld [vmem:[%s1187_s3 + $0x50] sm:$0xff] }
  0x17   :  { %839 = vmatpush1.bf16.msra.mxu1 %v838_v4  ;;  %832 = vmatprep.subr.msk.bf16.mxu0 %vm946_vm2, %v830_v5  ;;  %v562_v35 = vld [vmem:[%s1187_s3 + $0x60] sm:$0x7]  ;;  %v860_v36 = vpack.c.bf16 %v565_v29, %v561_v28  ;;  %v564_v38 = vld [vmem:[%s1187_s3 + $0x70] sm:$0x7] }
  0x18   :  { %842 = vmatprep.subr.msk.bf16.mxu1 %vm946_vm2, %v840_v9  ;;  %468 = vmatprep.mubr.f32.mxu0 %v870_v3  ;;  %v853_v39 = vpack.c.bf16 %v562_v35, %v558_v34  ;;  %v863_v40 = vpack.c.bf16 %v564_v38, %v560_v37 }
  0x19   :  { %539 = vmatprep.mubr.f32.mxu1 %v870_v3  ;;  %737 = vperm.xlu0 %869, %v734_v31  }
  0x1a   :  { %835 = vmatpush1.bf16.msk.msra.mxu0 %vm946_vm2, %v833_v15 }
  0x1b   :  { %845 = vmatpush1.bf16.msk.msra.mxu1 %vm946_vm2, %v843_v18  ;;  %847 = vmatprep.subr.bf16.mxu0 %v846_v19 }
  0x1c   :  { %857 = vmatprep.subr.bf16.mxu1 %v856_v23 }
  0x1d   :  { %776 = vmatmul.mubr.msk.f32.vlgmr.msra.gmra.mrb[4].mxu0 %vm43_vm3, %v973_v27 }
  0x1e   :  { %779 = vmatmul.mubr.msk.f32.vlgmr.msra.gmra.mrb[4].mxu1 %vm43_vm3, %v973_v27  ;;  %849 = vmatpush1.bf16.msra.mxu0 %v848_v30 }
  0x1f   :  { %859 = vmatpush1.bf16.msra.mxu1 %v858_v32  ;;  %852 = vmatprep.subr.msk.bf16.mxu0 %vm946_vm2, %v850_v33 }
  0x20   :  { %862 = vmatprep.subr.msk.bf16.mxu1 %vm946_vm2, %v860_v36  ;;  %642 = vmatprep.mubr.f32.mxu0 %v870_v3 }
  0x21   :  { %713 = vmatprep.mubr.f32.mxu1 %v870_v3 }
  0x22   :  { %855 = vmatpush1.bf16.msk.msra.mxu0 %vm946_vm2, %v853_v39 }
  0x23   :  { %865 = vmatpush1.bf16.msk.msra.mxu1 %vm946_vm2, %v863_v40 }
  0x25   :  { %782 = vmatmul.mubr.msk.f32.vlgmr.msra.gmra.mrb[6].mxu0 %vm43_vm3, %v973_v27 }
  0x26   :  { %785 = vmatmul.mubr.msk.f32.vlgmr.msra.gmra.mrb[6].mxu1 %vm43_vm3, %v973_v27 }
  0x94   :  { %v728_v58 = vpop.permute.xlu0 %727 }
  0x98   :  { %v738_v6 = vpop.permute.xlu0 %737 }
  0xe0   :  { %v126_v41 = vpop.f32.mrb[0].mxu0 }
  0xe1   :  { %v197_v42 = vpop.f32.mrb[0].mxu1  ;;  %v128_v43 = vpop.f32.mrb[1].mxu0 }
  0xe2   :  { %v199_v44 = vpop.f32.mrb[1].mxu1 }
  0xe8   :  { %v296_v45 = vpop.f32.mrb[2].mxu0 }
  0xe9   :  { %v372_v46 = vmax.f32 %v126_v41, %v296_v45  ;;  %v367_v47 = vpop.f32.mrb[2].mxu1  ;;  %v298_v3 = vpop.f32.mrb[3].mxu0 }
  0xea   :  { %v374_v48 = vmax.f32 %v197_v42, %v367_v47  ;;  %v373_v49 = vmax.f32 %v128_v43, %v298_v3  ;;  %v369_v50 = vpop.f32.mrb[3].mxu1 }
  0xeb   :  { %v375_v51 = vmax.f32 %v199_v44, %v369_v50 }
  0xf0   :  { %v470_v16 = vpop.f32.mrb[4].mxu0 }
  0xf1   :  { %v546_v52 = vmax.f32 %v372_v46, %v470_v16  ;;  %v541_v53 = vpop.f32.mrb[4].mxu1  ;;  %v472_v54 = vpop.f32.mrb[5].mxu0 }
  0xf2   :  { %v548_v55 = vmax.f32 %v374_v48, %v541_v53  ;;  %v547_v56 = vmax.f32 %v373_v49, %v472_v54  ;;  %v543_v57 = vpop.f32.mrb[5].mxu1 }
  0xf3   :  { %v549_v27 = vmax.f32 %v375_v51, %v543_v57 }
  0xf8   :  { %v644_v59 = vpop.f32.mrb[6].mxu0 }
  0xf9   :  { %v720_v60 = vmax.f32 %v546_v52, %v644_v59  ;;  %v715_v61 = vpop.f32.mrb[6].mxu1  ;;  %v646_v62 = vpop.f32.mrb[7].mxu0 }
  0xfa   :  { %v722_v63 = vmax.f32 %v548_v55, %v715_v61  ;;  %v721_v0 = vmax.f32 %v547_v56, %v646_v62  ;;  %v717_v1 = vpop.f32.mrb[7].mxu1 }
  0xfb   :  { %v730_v2 = vmul.f32 %v728_v58, %v720_v60  ;;  %v723_v4 = vmax.f32 %v549_v27, %v717_v1 }
  0xfc   :  { %v732_v5 = vmul.f32 %v728_v58, %v722_v63  ;;  %v731_v7 = vmul.f32 %v728_v58, %v721_v0 }
  0xfd   :  { %v740_v8 = vadd.f32 %v738_v6, %v730_v2  ;;  %v733_v9 = vmul.f32 %v728_v58, %v723_v4 }
  0xfe   :  { %v742_v10 = vadd.f32 %v738_v6, %v732_v5  ;;  %v741_v11 = vadd.f32 %v738_v6, %v731_v7 }
  0xff   :  { %v744_v12 = vmax.f32 %v740_v8, 0.0  ;;  %v743_v13 = vadd.f32 %v738_v6, %v733_v9 }
 0x100   :  { %v746_v14 = vmax.f32 %v742_v10, 0.0  ;;  %v745_v15 = vmax.f32 %v741_v11, 0.0 }
 0x101   :  { %v747_v17 = vmax.f32 %v743_v13, 0.0 }
 0x102   :  { %v752_v18 = vcombine.low %v744_v12, %v745_v15 }
 0x103   :  { %v753_v19 = vcombine.low %v746_v14, %v747_v17 }
 0x104   :  { %756 = vst [vmem:[%s1190_s7] sm:$0x77] %v752_v18 }
 0x105   :  { %757 = vst [vmem:[%s1190_s7 + $0x8] sm:$0x77] %v753_v19 }

// kernel: mynet2_forward.10
= control target key start
LH: loop header
LB: loop body
LE: loop exit
PB: predicated region body
PF: predicated region fallthrough
CT: control target
= control target key end

     0   :  { %vm38_vm0 = vcmask 1042432   ;;  %v255_v3 = vmov 0.0   ;;  %v256_v8 = vmov 0   ;;  %vm257_vm1 = vmmov 1   ;;  %s365_s0 = inlined_call_operand.vmem [shape: f32[27,512], index: 0, kind: input, shape index: {}]   ;;  %s366_s2 = inlined_call_operand.vmem [shape: f32[6,1], index: 2, kind: input, shape index: {}]   ;;  %s367_s1 = inlined_call_operand.vmem [shape: f32[6,27], index: 1, kind: input, shape index: {}]   ;;  %s368_s3 = inlined_call_operand.vmem [shape: f32[6,1], index: 3, kind: input, shape index: {}]   ;;  %s369_s4 = inlined_call_operand.vmem [shape: f32[6,512], index: 4, kind: output, shape index: {}]  }
   0x1   :  { %v19_v0 = vld [vmem:[%s365_s0 + $0x8] sm:$0xff]  ;;  %v21_v2 = vld [vmem:[%s365_s0 + $0x18] sm:$0xff]  ;;  %115 = vmatprep.mubr.f32.mxu0 %v255_v3  ;;  %186 = vmatprep.mubr.f32.mxu1 %v255_v3  ;;  %v18_v6 = vld [vmem:[%s365_s0] sm:$0xff]  ;;  %vm34_vm3 = vcmask 220160  }
   0x2   :  { %v23_v1 = vld [vmem:[%s365_s0 + $0x28] sm:$0xff]  ;;  %v25_v5 = vld [vmem:[%s365_s0 + $0x38] sm:$0xff]  ;;  %v22_v7 = vld [vmem:[%s365_s0 + $0x20] sm:$0xff]  ;;  %254 = vset.pattern.permute.xlu0 %v256_v8 }
   0x3   :  { %v231_v4 = vpack.c.bf16 %v23_v1, %v19_v0  ;;  %v241_v9 = vpack.c.bf16 %v25_v5, %v21_v2  ;;  %v233_v10 = vpack.c.bf16 %v22_v7, %v18_v6  ;;  %v20_v11 = vld [vmem:[%s365_s0 + $0x10] sm:$0xff]  ;;  %v27_v13 = vld [vmem:[%s365_s0 + $0x48] sm:$0xff]  ;;  %vm314_vm2 = vmpackc.low %vm38_vm0, %vm257_vm1 }
   0x4   :  { %v24_v12 = vld [vmem:[%s365_s0 + $0x30] sm:$0xff]  ;;  %v31_v15 = vld [vmem:[%s365_s0 + $0x68] sm:$0x7]  ;;  %v29_v17 = vld [vmem:[%s365_s0 + $0x58] sm:$0xff] }
   0x5   :  { %232 = vmatprep.subr.bf16.mxu0 %v231_v4  ;;  %v243_v14 = vpack.c.bf16 %v24_v12, %v20_v11  ;;  %242 = vmatprep.subr.bf16.mxu1 %v241_v9  ;;  %v235_v18 = vpack.c.bf16 %v31_v15, %v27_v13  ;;  %v33_v19 = vld [vmem:[%s365_s0 + $0x78] sm:$0x7]  ;;  %v26_v20 = vld [vmem:[%s365_s0 + $0x40] sm:$0xff]  ;;  %v28_v24 = vld [vmem:[%s365_s0 + $0x50] sm:$0xff] }
   0x6   :  { %234 = vmatpush1.bf16.msra.mxu0 %v233_v10  ;;  %v30_v21 = vld [vmem:[%s365_s0 + $0x60] sm:$0x7]  ;;  %v245_v22 = vpack.c.bf16 %v33_v19, %v29_v17  ;;  %v32_v25 = vld [vmem:[%s365_s0 + $0x70] sm:$0x7] }
   0x7   :  { %244 = vmatpush1.bf16.msra.mxu1 %v243_v14  ;;  %v238_v23 = vpack.c.bf16 %v30_v21, %v26_v20  ;;  %237 = vmatprep.subr.msk.bf16.mxu0 %vm314_vm2, %v235_v18  ;;  %v248_v26 = vpack.c.bf16 %v32_v25, %v28_v24  ;;  %v193_v27 = vld [vmem:[%s366_s2] sm:$0x3f] }
   0x8   :  { %247 = vmatprep.subr.msk.bf16.mxu1 %vm314_vm2, %v245_v22  ;;  %196 = vperm.xlu0 %254, %v193_v27   ;;  %v17_v28 = vld [vmem:[%s367_s1] sm:$0x3f] }
   0x9   :  { %v203_v29 = vld [vmem:[%s368_s3] sm:$0x3f] }
   0xa   :  { %240 = vmatpush1.bf16.msk.msra.mxu0 %vm314_vm2, %v238_v23 }
   0xb   :  { %250 = vmatpush1.bf16.msk.msra.mxu1 %vm314_vm2, %v248_v26 }
   0xc   :  { %206 = vperm.xlu0 %254, %v203_v29  }
   0xd   :  { %227 = vmatmul.mubr.msk.f32.vlgmr.msra.gmra.mrb[0].mxu0 %vm34_vm3, %v17_v28 }
   0xe   :  { %230 = vmatmul.mubr.msk.f32.vlgmr.msra.gmra.mrb[0].mxu1 %vm34_vm3, %v17_v28 }
  0x87   :  { %v197_v30 = vpop.permute.xlu0 %196 }
  0x8b   :  { %v207_v35 = vpop.permute.xlu0 %206 }
  0xe0   :  { %v117_v31 = vpop.f32.mrb[0].mxu0 }
  0xe1   :  { %v199_v32 = vmul.f32 %v197_v30, %v117_v31  ;;  %v188_v33 = vpop.f32.mrb[0].mxu1  ;;  %v119_v34 = vpop.f32.mrb[1].mxu0 }
  0xe2   :  { %v201_v36 = vmul.f32 %v197_v30, %v188_v33  ;;  %v200_v37 = vmul.f32 %v197_v30, %v119_v34  ;;  %v190_v38 = vpop.f32.mrb[1].mxu1 }
  0xe3   :  { %v209_v39 = vadd.f32 %v207_v35, %v199_v32  ;;  %v202_v40 = vmul.f32 %v197_v30, %v190_v38 }
  0xe4   :  { %v211_v41 = vadd.f32 %v207_v35, %v201_v36  ;;  %v210_v42 = vadd.f32 %v207_v35, %v200_v37 }
  0xe5   :  { %v213_v43 = vmax.f32 %v209_v39, 0.0  ;;  %v212_v44 = vadd.f32 %v207_v35, %v202_v40 }
  0xe6   :  { %v215_v45 = vmax.f32 %v211_v41, 0.0  ;;  %v214_v46 = vmax.f32 %v210_v42, 0.0 }
  0xe7   :  { %217 = vst [vmem:[%s369_s4] sm:$0x3f] %v213_v43  ;;  %v216_v47 = vmax.f32 %v212_v44, 0.0 }
  0xe8   :  { %219 = vst [vmem:[%s369_s4 + $0x10] sm:$0x3f] %v215_v45  ;;  %218 = vst [vmem:[%s369_s4 + $0x8] sm:$0x3f] %v214_v46 }
  0xe9   :  { %220 = vst [vmem:[%s369_s4 + $0x18] sm:$0x3f] %v216_v47 }

// kernel: mynet2_forward.11
= control target key start
LH: loop header
LB: loop body
LE: loop exit
PB: predicated region body
PF: predicated region fallthrough
CT: control target
= control target key end

     0   :  { %v524_v0 = vmov 0.0|0.0   ;;  %vm525_vm0 = vmmov 0   ;;  %v526_v8 = vmov 0.0   ;;  %v527_v12 = vmov 0   ;;  %s696_s0 = inlined_call_operand.vmem [shape: f32[54,128], index: 0, kind: input, shape index: {}]   ;;  %s697_s1 = inlined_call_operand.vmem [shape: f32[54,128], index: 1, kind: input, shape index: {}]   ;;  %s698_s5 = inlined_call_operand.vmem [shape: f32[6,1], index: 5, kind: input, shape index: {}]   ;;  %s699_s2 = inlined_call_operand.vmem [shape: f32[54,128], index: 2, kind: input, shape index: {}]   ;;  %s700_s6 = inlined_call_operand.vmem [shape: f32[6,1], index: 6, kind: input, shape index: {}]   ;;  %s701_s3 = inlined_call_operand.vmem [shape: f32[54,128], index: 3, kind: input, shape index: {}]   ;;  %s702_s4 = inlined_call_operand.vmem [shape: f32[6,54], index: 4, kind: input, shape index: {}]   ;;  %s703_s7 = inlined_call_operand.vmem [shape: f32[6,128], index: 7, kind: output, shape index: {}]  }
   0x1   :  { %483 = vmatprep.subr.bf16.mxu0 %v524_v0  ;;  %v27_v1 = vld [vmem:[%s696_s0] sm:$0xff]  ;;  %v28_v2 = vld [vmem:[%s696_s0 + $0x8] sm:$0xff]  ;;  %492 = vmatprep.subr.bf16.mxu1 %v524_v0  ;;  %v29_v6 = vld [vmem:[%s696_s0 + $0x10] sm:$0xff]  ;;  %vm38_vm1 = vcmask 1045504   ;;  %vm34_vm2 = vcmask 441344  }
   0x2   :  { %v112_v3 = vld [vmem:[%s697_s1] sm:$0xff]  ;;  %v484_v4 = vpack.c.bf16 %v28_v2, %v27_v1  ;;  %v113_v5 = vld [vmem:[%s697_s1 + $0x8] sm:$0xff]  ;;  %v30_v7 = vld [vmem:[%s696_s0 + $0x18] sm:$0xff]  ;;  %429 = vmatprep.mubr.msk.f32.mxu0 %vm525_vm0, %v526_v8  ;;  %446 = vmatprep.mubr.msk.f32.mxu1 %vm525_vm0, %v526_v8 }
   0x3   :  { %v493_v9 = vpack.c.bf16 %v113_v5, %v112_v3  ;;  %v114_v10 = vld [vmem:[%s697_s1 + $0x10] sm:$0xff]  ;;  %v115_v11 = vld [vmem:[%s697_s1 + $0x18] sm:$0xff]  ;;  %523 = vset.pattern.permute.xlu0 %v527_v12  ;;  %v487_v13 = vpack.c.bf16 %v30_v7, %v29_v6  ;;  %v31_v15 = vld [vmem:[%s696_s0 + $0x20] sm:$0xff] }
   0x4   :  { %485 = vmatpush3.bf16.msra.mxu0 %v484_v4  ;;  %v496_v14 = vpack.c.bf16 %v115_v11, %v114_v10  ;;  %v32_v16 = vld [vmem:[%s696_s0 + $0x28] sm:$0xff]  ;;  %v116_v17 = vld [vmem:[%s697_s1 + $0x20] sm:$0xff]  ;;  %v33_v25 = vld [vmem:[%s696_s0 + $0x30] sm:$0x3f] }
   0x5   :  { %494 = vmatpush3.bf16.msra.mxu1 %v493_v9  ;;  %486 = vmatprep.subr.bf16.mxu0 %v524_v0  ;;  %v117_v18 = vld [vmem:[%s697_s1 + $0x28] sm:$0xff]  ;;  %v490_v19 = vpack.c.bf16 %v32_v16, %v31_v15  ;;  %v355_v21 = vld [vmem:[%s698_s5] sm:$0x3f]  ;;  %v118_v29 = vld [vmem:[%s697_s1 + $0x30] sm:$0x3f] }
   0x6   :  { %495 = vmatprep.subr.bf16.mxu1 %v524_v0  ;;  %v499_v20 = vpack.c.bf16 %v117_v18, %v116_v17  ;;  %358 = vperm.xlu0 %523, %v355_v21   ;;  %v193_v22 = vld [vmem:[%s699_s2] sm:$0xff]  ;;  %v194_v23 = vld [vmem:[%s699_s2 + $0x8] sm:$0xff]  ;;  %v195_v32 = vld [vmem:[%s699_s2 + $0x10] sm:$0xff] }
   0x7   :  { %v362_v24 = vld [vmem:[%s700_s6] sm:$0x3f]  ;;  %v275_v27 = vld [vmem:[%s701_s3 + $0x8] sm:$0xff]  ;;  %v502_v30 = vpack.c.bf16 %v194_v23, %v193_v22  ;;  %v196_v33 = vld [vmem:[%s699_s2 + $0x18] sm:$0xff] }
   0x8   :  { %488 = vmatpush3.bf16.msra.mxu0 %v487_v13  ;;  %v274_v26 = vld [vmem:[%s701_s3] sm:$0xff]  ;;  %v276_v34 = vld [vmem:[%s701_s3 + $0x10] sm:$0xff]  ;;  %v277_v35 = vld [vmem:[%s701_s3 + $0x18] sm:$0xff]  ;;  %v505_v36 = vpack.c.bf16 %v196_v33, %v195_v32 }
   0x9   :  { %497 = vmatpush3.bf16.msra.mxu1 %v496_v14  ;;  %489 = vmatprep.subr.bf16.mxu0 %v524_v0  ;;  %v26_v28 = vld [vmem:[%s702_s4] sm:$0x3f]  ;;  %v511_v31 = vpack.c.bf16 %v275_v27, %v274_v26  ;;  %v514_v37 = vpack.c.bf16 %v277_v35, %v276_v34  ;;  %v198_v39 = vld [vmem:[%s699_s2 + $0x28] sm:$0xff]  ;;  %v199_v44 = vld [vmem:[%s699_s2 + $0x30] sm:$0x3f] }
   0xa   :  { %498 = vmatprep.subr.bf16.mxu1 %v524_v0  ;;  %365 = vperm.xlu0 %523, %v362_v24   ;;  %v197_v38 = vld [vmem:[%s699_s2 + $0x20] sm:$0xff]  ;;  %v279_v41 = vld [vmem:[%s701_s3 + $0x28] sm:$0xff]  ;;  %v280_v45 = vld [vmem:[%s701_s3 + $0x30] sm:$0x3f] }
   0xb   :  { %v278_v40 = vld [vmem:[%s701_s3 + $0x20] sm:$0xff]  ;;  %v508_v42 = vpack.c.bf16 %v198_v39, %v197_v38 }
   0xc   :  { %491 = vmatpush3.bf16.msra.mxu0 %v490_v19  ;;  %v517_v43 = vpack.c.bf16 %v279_v41, %v278_v40 }
   0xd   :  { %500 = vmatpush3.bf16.msra.mxu1 %v499_v20  ;;  %427 = vmatprep.subr.mxu0 %v526_v8 }
   0xe   :  { %444 = vmatprep.subr.mxu1 %v526_v8 }
  0x10   :  { %428 = vmatpush3.msk.msra.mxu0 %vm38_vm1, %v33_v25 }
  0x11   :  { %430 = vmatmul.mubr.msk.f32.vlgmr.msra.gmra.mrb[0].mxu0 %vm34_vm2, %v26_v28  ;;  %445 = vmatpush3.msk.msra.mxu1 %vm38_vm1, %v118_v29 }
  0x12   :  { %501 = vmatprep.subr.bf16.mxu0 %v524_v0  ;;  %447 = vmatmul.mubr.msk.f32.vlgmr.msra.gmra.mrb[0].mxu1 %vm34_vm2, %v26_v28 }
  0x13   :  { %503 = vmatpush3.bf16.msra.mxu0 %v502_v30  ;;  %510 = vmatprep.subr.bf16.mxu1 %v524_v0 }
  0x14   :  { %512 = vmatpush3.bf16.msra.mxu1 %v511_v31  ;;  %504 = vmatprep.subr.bf16.mxu0 %v524_v0 }
  0x15   :  { %513 = vmatprep.subr.bf16.mxu1 %v524_v0  ;;  %463 = vmatprep.mubr.msk.f32.mxu0 %vm525_vm0, %v526_v8 }
  0x16   :  { %480 = vmatprep.mubr.msk.f32.mxu1 %vm525_vm0, %v526_v8 }
  0x17   :  { %506 = vmatpush3.bf16.msra.mxu0 %v505_v36 }
  0x18   :  { %515 = vmatpush3.bf16.msra.mxu1 %v514_v37  ;;  %507 = vmatprep.subr.bf16.mxu0 %v524_v0 }
  0x19   :  { %516 = vmatprep.subr.bf16.mxu1 %v524_v0 }
  0x1b   :  { %509 = vmatpush3.bf16.msra.mxu0 %v508_v42 }
  0x1c   :  { %518 = vmatpush3.bf16.msra.mxu1 %v517_v43  ;;  %461 = vmatprep.subr.mxu0 %v526_v8 }
  0x1d   :  { %478 = vmatprep.subr.mxu1 %v526_v8 }
  0x1f   :  { %462 = vmatpush3.msk.msra.mxu0 %vm38_vm1, %v199_v44 }
  0x20   :  { %464 = vmatmul.mubr.msk.f32.vlgmr.msra.gmra.mrb[2].mxu0 %vm34_vm2, %v26_v28  ;;  %479 = vmatpush3.msk.msra.mxu1 %vm38_vm1, %v280_v45 }
  0x21   :  { %481 = vmatmul.mubr.msk.f32.vlgmr.msra.gmra.mrb[2].mxu1 %vm34_vm2, %v26_v28 }
  0x85   :  { %v359_v51 = vpop.permute.xlu0 %358 }
  0x89   :  { %v366_v59 = vpop.permute.xlu0 %365 }
  0xe4   :  { %v108_v46 = vpop.f32.mrb[0].mxu0 }
  0xe5   :  { %v431_v47 = vpop.f32.mrb[1].mxu0  ;;  %v188_v48 = vpop.f32.mrb[0].mxu1 }
  0xe6   :  { %v192_v49 = vmax.f32 %v108_v46, %v188_v48  ;;  %v448_v50 = vpop.f32.mrb[1].mxu1 }
  0xf3   :  { %v269_v52 = vpop.f32.mrb[2].mxu0 }
  0xf4   :  { %v273_v53 = vmax.f32 %v192_v49, %v269_v52  ;;  %v465_v54 = vpop.f32.mrb[3].mxu0  ;;  %v350_v55 = vpop.f32.mrb[2].mxu1 }
  0xf5   :  { %v482_v56 = vpop.f32.mrb[3].mxu1 }
  0xf6   :  { %v354_v57 = vmax.f32 %v273_v53, %v350_v55 }
  0xf8   :  { %v361_v58 = vmul.f32 %v359_v51, %v354_v57 }
  0xfa   :  { %v368_v60 = vadd.f32 %v366_v59, %v361_v58 }
  0xfc   :  { %v369_v61 = vmax.f32 %v368_v60, 0.0 }
  0xfe   :  { %370 = vst [vmem:[%s703_s7] sm:$0x3f] %v369_v61 }

// kernel: mynet2_forward.12
= control target key start
LH: loop header
LB: loop body
LE: loop exit
PB: predicated region body
PF: predicated region fallthrough
CT: control target
= control target key end

     0   :  { %vm26_vm0 = vcmask 441344   ;;  %v192_v3 = vmov 0   ;;  %vm33_vm1 = vcmask 1045504   ;;  %s265_s0 = inlined_call_operand.vmem [shape: f32[54,128], index: 0, kind: input, shape index: {}]   ;;  %s266_s1 = inlined_call_operand.vmem [shape: f32[12,54], index: 1, kind: input, shape index: {}]   ;;  %s267_s2 = inlined_call_operand.vmem [shape: f32[12,1], index: 2, kind: input, shape index: {}]   ;;  %s268_s3 = inlined_call_operand.vmem [shape: f32[12,1], index: 3, kind: input, shape index: {}]   ;;  %s269_s4 = inlined_call_operand.vmem [shape: f32[12,128], index: 4, kind: output, shape index: {}]  }
   0x1   :  { %v19_v0 = vld [vmem:[%s265_s0] sm:$0xff]  ;;  %v20_v1 = vld [vmem:[%s265_s0 + $0x8] sm:$0xff]  ;;  %v21_v2 = vld [vmem:[%s265_s0 + $0x10] sm:$0xff]  ;;  %190 = vset.pattern.permute.xlu0 %v192_v3  ;;  %191 = vset.pattern.permute.xlu1 %v192_v3 }
   0x2   :  { %v177_v4 = vpack.c.bf16 %v20_v1, %v19_v0  ;;  %v22_v5 = vld [vmem:[%s265_s0 + $0x18] sm:$0xff]  ;;  %v23_v7 = vld [vmem:[%s265_s0 + $0x20] sm:$0xff]  ;;  %v24_v8 = vld [vmem:[%s265_s0 + $0x28] sm:$0xff] }
   0x3   :  { %v181_v6 = vpack.c.bf16 %v22_v5, %v21_v2  ;;  %v17_v9 = vld [vmem:[%s266_s1] sm:$0xff]  ;;  %v185_v12 = vpack.c.bf16 %v24_v8, %v23_v7  ;;  %v113_v13 = vld [vmem:[%s267_s2 + $0x8] sm:$0xf]  ;;  %v25_v15 = vld [vmem:[%s265_s0 + $0x30] sm:$0x3f] }
   0x4   :  { %178 = vmatprep.subr.bf16.mxu0 %v177_v4  ;;  %174 = vmatprep.mubr.msk.f32.mxu0 %vm26_vm0, %v17_v9  ;;  %v112_v10 = vld [vmem:[%s267_s2] sm:$0xff]  ;;  %v127_v14 = vld [vmem:[%s268_s3 + $0x8] sm:$0xf] }
   0x5   :  { %v126_v11 = vld [vmem:[%s268_s3] sm:$0xff]  ;;  %180 = vmatpush3.bf16.msra.mxu0 %v177_v4  ;;  %116 = vperm.xlu0 %190, %v112_v10   ;;  %v18_v16 = vld [vmem:[%s266_s1 + $0x8] sm:$0xf] }
   0x6   :  { %182 = vmatprep.subr.bf16.mxu0 %v181_v6  ;;  %130 = vperm.xlu1 %191, %v126_v11  }
   0x9   :  { %184 = vmatpush3.bf16.msra.mxu0 %v181_v6  ;;  %121 = vperm.xlu0 %190, %v113_v13  }
   0xa   :  { %186 = vmatprep.subr.bf16.mxu0 %v185_v12  ;;  %135 = vperm.xlu1 %191, %v127_v14  }
   0xd   :  { %188 = vmatpush3.bf16.msra.mxu0 %v185_v12 }
   0xe   :  { %172 = vmatprep.subr.msk.mxu0 %vm33_vm1, %v25_v15 }
  0x11   :  { %173 = vmatpush3.msk.msra.mxu0 %vm33_vm1, %v25_v15 }
  0x12   :  { %175 = vmatmul.mubr.msk.f32.vlgmr.msra.gmra.mrb[0].mxu0 %vm26_vm0, %v18_v16 }
  0x84   :  { %v117_v17 = vpop.permute.xlu0 %116 }
  0x85   :  { %v131_v18 = vpop.permute.xlu1 %130 }
  0x88   :  { %v122_v19 = vpop.permute.xlu0 %121 }
  0x89   :  { %v136_v23 = vpop.permute.xlu1 %135 }
  0xe5   :  { %v176_v20 = vpop.f32.mrb[0].mxu0 }
  0xe6   :  { %v125_v21 = vmul.f32 %v176_v20, %v122_v19  ;;  %v103_v22 = vpop.f32.mrb[1].mxu0 }
  0xe7   :  { %v124_v24 = vmul.f32 %v117_v17, %v103_v22 }
  0xe8   :  { %v139_v25 = vadd.f32 %v136_v23, %v125_v21 }
  0xe9   :  { %v138_v26 = vadd.f32 %v131_v18, %v124_v24 }
  0xea   :  { %v141_v27 = vmax.f32 %v139_v25, 0.0 }
  0xeb   :  { %v140_v28 = vmax.f32 %v138_v26, 0.0 }
  0xec   :  { %143 = vst [vmem:[%s269_s4 + $0x8] sm:$0xf] %v141_v27 }
  0xed   :  { %142 = vst [vmem:[%s269_s4] sm:$0xff] %v140_v28 }

// kernel: mynet2_forward.13
= control target key start
LH: loop header
LB: loop body
LE: loop exit
PB: predicated region body
PF: predicated region fallthrough
CT: control target
= control target key end

     0   :  { %v772_v3 = vmov 0   ;;  %vm42_vm0 = vcmask 883712   ;;  %vm49_vm1 = vcmask 1043456   ;;  %vm773_vm2 = vmmov 1   ;;  %s1047_s0 = inlined_call_operand.vmem [shape: f32[108,32], index: 0, kind: input, shape index: {}]   ;;  %s1048_s1 = inlined_call_operand.vmem [shape: f32[108,32], index: 1, kind: input, shape index: {}]   ;;  %s1049_s4 = inlined_call_operand.vmem [shape: f32[12,108], index: 4, kind: input, shape index: {}]   ;;  %s1050_s5 = inlined_call_operand.vmem [shape: f32[12,1], index: 5, kind: input, shape index: {}]   ;;  %s1051_s6 = inlined_call_operand.vmem [shape: f32[12,1], index: 6, kind: input, shape index: {}]   ;;  %s1052_s2 = inlined_call_operand.vmem [shape: f32[108,32], index: 2, kind: input, shape index: {}]   ;;  %s1053_s3 = inlined_call_operand.vmem [shape: f32[108,32], index: 3, kind: input, shape index: {}]   ;;  %s1054_s7 = inlined_call_operand.vmem [shape: f32[12,32], index: 7, kind: output, shape index: {}]  }
   0x1   :  { %v28_v0 = vld [vmem:[%s1047_s0] sm:$0xff]  ;;  %v29_v1 = vld [vmem:[%s1047_s0 + $0x8] sm:$0xff]  ;;  %770 = vset.pattern.permute.xlu0 %v772_v3  ;;  %771 = vset.pattern.permute.xlu1 %v772_v3  ;;  %v30_v6 = vld [vmem:[%s1047_s0 + $0x10] sm:$0xff]  ;;  %vm442_vm4 = vcmask 257024   ;;  %vm440_vm5 = vcmask 261120  }
   0x2   :  { %v128_v2 = vld [vmem:[%s1048_s1] sm:$0xff]  ;;  %v648_v4 = vpack.c.bf16 %v29_v1, %v28_v0  ;;  %v129_v5 = vld [vmem:[%s1048_s1 + $0x8] sm:$0xff]  ;;  %v31_v7 = vld [vmem:[%s1047_s0 + $0x18] sm:$0xff] }
   0x3   :  { %v678_v8 = vpack.c.bf16 %v129_v5, %v128_v2  ;;  %v652_v9 = vpack.c.bf16 %v31_v7, %v30_v6  ;;  %v130_v10 = vld [vmem:[%s1048_s1 + $0x10] sm:$0xff]  ;;  %v131_v11 = vld [vmem:[%s1048_s1 + $0x18] sm:$0xff]  ;;  %v32_v12 = vld [vmem:[%s1047_s0 + $0x20] sm:$0xff] }
   0x4   :  { %649 = vmatprep.subr.bf16.mxu0 %v648_v4  ;;  %v682_v13 = vpack.c.bf16 %v131_v11, %v130_v10  ;;  %v33_v14 = vld [vmem:[%s1047_s0 + $0x28] sm:$0xff]  ;;  %v132_v15 = vld [vmem:[%s1048_s1 + $0x20] sm:$0xff]  ;;  %v34_v19 = vld [vmem:[%s1047_s0 + $0x30] sm:$0xff] }
   0x5   :  { %v133_v16 = vld [vmem:[%s1048_s1 + $0x28] sm:$0xff]  ;;  %679 = vmatprep.subr.bf16.mxu1 %v678_v8  ;;  %651 = vmatpush3.bf16.msra.mxu0 %v648_v4  ;;  %v656_v17 = vpack.c.bf16 %v33_v14, %v32_v12  ;;  %v35_v20 = vld [vmem:[%s1047_s0 + $0x38] sm:$0xff]  ;;  %v134_v21 = vld [vmem:[%s1048_s1 + $0x30] sm:$0xff] }
   0x6   :  { %681 = vmatpush3.bf16.msra.mxu1 %v678_v8  ;;  %653 = vmatprep.subr.bf16.mxu0 %v652_v9  ;;  %v686_v18 = vpack.c.bf16 %v133_v16, %v132_v15  ;;  %v135_v22 = vld [vmem:[%s1048_s1 + $0x38] sm:$0xff]  ;;  %v660_v23 = vpack.c.bf16 %v35_v20, %v34_v19  ;;  %v865_v24 = vld [vmem:[%s1049_s4] sm:$0xff]  ;;  %v37_v27 = vld [vmem:[%s1047_s0 + $0x48] sm:$0xff] }
   0x7   :  { %683 = vmatprep.subr.bf16.mxu1 %v682_v13  ;;  %v690_v25 = vpack.c.bf16 %v135_v22, %v134_v21  ;;  %v36_v26 = vld [vmem:[%s1047_s0 + $0x40] sm:$0xff]  ;;  %552 = vmatprep.mubr.msk.f32.mxu0 %vm42_vm0, %v865_v24  ;;  %v137_v29 = vld [vmem:[%s1048_s1 + $0x48] sm:$0xff]  ;;  %v38_v32 = vld [vmem:[%s1047_s0 + $0x50] sm:$0xff] }
   0x8   :  { %v136_v28 = vld [vmem:[%s1048_s1 + $0x40] sm:$0xff]  ;;  %583 = vmatprep.mubr.msk.f32.mxu1 %vm42_vm0, %v865_v24  ;;  %v664_v30 = vpack.c.bf16 %v37_v27, %v36_v26  ;;  %v39_v33 = vld [vmem:[%s1047_s0 + $0x58] sm:$0xff]  ;;  %v138_v34 = vld [vmem:[%s1048_s1 + $0x50] sm:$0xff] }
   0x9   :  { %655 = vmatpush3.bf16.msra.mxu0 %v652_v9  ;;  %v694_v31 = vpack.c.bf16 %v137_v29, %v136_v28  ;;  %v139_v35 = vld [vmem:[%s1048_s1 + $0x58] sm:$0xff]  ;;  %v668_v36 = vpack.c.bf16 %v39_v33, %v38_v32  ;;  %v40_v38 = vld [vmem:[%s1047_s0 + $0x60] sm:$0xff]  ;;  %v41_v39 = vld [vmem:[%s1047_s0 + $0x68] sm:$0xf] }
   0xa   :  { %685 = vmatpush3.bf16.msra.mxu1 %v682_v13  ;;  %657 = vmatprep.subr.bf16.mxu0 %v656_v17  ;;  %v698_v37 = vpack.c.bf16 %v139_v35, %v138_v34  ;;  %v140_v40 = vld [vmem:[%s1048_s1 + $0x60] sm:$0xff]  ;;  %v141_v41 = vld [vmem:[%s1048_s1 + $0x68] sm:$0xf]  ;;  %v672_v44 = vpack.c.bf16 %v41_v39, %v40_v38  ;;  %vm917_vm3 = vmpackc.low %vm49_vm1, %vm773_vm2 }
   0xb   :  { %687 = vmatprep.subr.bf16.mxu1 %v686_v18  ;;  %v410_v42 = vld [vmem:[%s1050_s5] sm:$0xff]  ;;  %v411_v45 = vld [vmem:[%s1050_s5 + $0x8] sm:$0xf]  ;;  %v702_v47 = vpack.c.bf16 %v141_v41, %v140_v40  ;;  %v224_v55 = vld [vmem:[%s1052_s2 + $0x10] sm:$0xff] }
   0xc   :  { %414 = vperm.xlu0 %770, %v410_v42   ;;  %v424_v43 = vld [vmem:[%s1051_s6] sm:$0xff]  ;;  %v223_v49 = vld [vmem:[%s1052_s2 + $0x8] sm:$0xff]  ;;  %v225_v56 = vld [vmem:[%s1052_s2 + $0x18] sm:$0xff] }
   0xd   :  { %659 = vmatpush3.bf16.msra.mxu0 %v656_v17  ;;  %v222_v48 = vld [vmem:[%s1052_s2] sm:$0xff]  ;;  %428 = vperm.xlu1 %771, %v424_v43   ;;  %v317_v51 = vld [vmem:[%s1053_s3 + $0x8] sm:$0xff]  ;;  %v318_v57 = vld [vmem:[%s1053_s3 + $0x10] sm:$0xff]  ;;  %v712_v60 = vpack.c.bf16 %v225_v56, %v224_v55 }
   0xe   :  { %689 = vmatpush3.bf16.msra.mxu1 %v686_v18  ;;  %661 = vmatprep.subr.bf16.mxu0 %v660_v23  ;;  %v316_v50 = vld [vmem:[%s1053_s3] sm:$0xff]  ;;  %v425_v52 = vld [vmem:[%s1051_s6 + $0x8] sm:$0xf]  ;;  %v708_v53 = vpack.c.bf16 %v223_v49, %v222_v48  ;;  %v319_v58 = vld [vmem:[%s1053_s3 + $0x18] sm:$0xff] }
   0xf   :  { %691 = vmatprep.subr.bf16.mxu1 %v690_v25  ;;  %v738_v54 = vpack.c.bf16 %v317_v51, %v316_v50  ;;  %v957_v59 = vld [vmem:[%s1049_s4 + $0x8] sm:$0xf]  ;;  %v742_v61 = vpack.c.bf16 %v319_v58, %v318_v57  ;;  %v226_v62 = vld [vmem:[%s1052_s2 + $0x20] sm:$0xff]  ;;  %v228_v4 = vld [vmem:[%s1052_s2 + $0x30] sm:$0xff] }
  0x10   :  { %419 = vperm.xlu0 %770, %v411_v45   ;;  %v227_v63 = vld [vmem:[%s1052_s2 + $0x28] sm:$0xff]  ;;  %v320_v0 = vld [vmem:[%s1053_s3 + $0x20] sm:$0xff]  ;;  %v229_v5 = vld [vmem:[%s1052_s2 + $0x38] sm:$0xff] }
  0x11   :  { %663 = vmatpush3.bf16.msra.mxu0 %v660_v23  ;;  %433 = vperm.xlu1 %771, %v425_v52   ;;  %v321_v1 = vld [vmem:[%s1053_s3 + $0x28] sm:$0xff]  ;;  %v716_v2 = vpack.c.bf16 %v227_v63, %v226_v62  ;;  %v322_v6 = vld [vmem:[%s1053_s3 + $0x30] sm:$0xff]  ;;  %v323_v7 = vld [vmem:[%s1053_s3 + $0x38] sm:$0xff]  ;;  %v720_v8 = vpack.c.bf16 %v229_v5, %v228_v4 }
  0x12   :  { %693 = vmatpush3.bf16.msra.mxu1 %v690_v25  ;;  %665 = vmatprep.subr.bf16.mxu0 %v664_v30  ;;  %v746_v3 = vpack.c.bf16 %v321_v1, %v320_v0  ;;  %v750_v9 = vpack.c.bf16 %v323_v7, %v322_v6  ;;  %v230_v10 = vld [vmem:[%s1052_s2 + $0x40] sm:$0xff]  ;;  %v231_v11 = vld [vmem:[%s1052_s2 + $0x48] sm:$0xff]  ;;  %v232_v16 = vld [vmem:[%s1052_s2 + $0x50] sm:$0xff] }
  0x13   :  { %695 = vmatprep.subr.bf16.mxu1 %v694_v31  ;;  %v324_v12 = vld [vmem:[%s1053_s3 + $0x40] sm:$0xff]  ;;  %v325_v13 = vld [vmem:[%s1053_s3 + $0x48] sm:$0xff]  ;;  %v724_v14 = vpack.c.bf16 %v231_v11, %v230_v10  ;;  %v233_v17 = vld [vmem:[%s1052_s2 + $0x58] sm:$0xff] }
  0x14   :  { %v754_v15 = vpack.c.bf16 %v325_v13, %v324_v12  ;;  %v326_v18 = vld [vmem:[%s1053_s3 + $0x50] sm:$0xff]  ;;  %v327_v19 = vld [vmem:[%s1053_s3 + $0x58] sm:$0xff]  ;;  %v728_v20 = vpack.c.bf16 %v233_v17, %v232_v16  ;;  %v234_v22 = vld [vmem:[%s1052_s2 + $0x60] sm:$0xff] }
  0x15   :  { %667 = vmatpush3.bf16.msra.mxu0 %v664_v30  ;;  %v758_v21 = vpack.c.bf16 %v327_v19, %v326_v18  ;;  %v235_v23 = vld [vmem:[%s1052_s2 + $0x68] sm:$0xf] }
  0x16   :  { %697 = vmatpush3.bf16.msra.mxu1 %v694_v31  ;;  %669 = vmatprep.subr.bf16.mxu0 %v668_v36  ;;  %v329_v25 = vld [vmem:[%s1053_s3 + $0x68] sm:$0xf]  ;;  %v732_v26 = vpack.c.bf16 %v235_v23, %v234_v22 }
  0x17   :  { %699 = vmatprep.subr.bf16.mxu1 %v698_v37 }
  0x19   :  { %671 = vmatpush3.bf16.msra.mxu0 %v668_v36 }
  0x1a   :  { %701 = vmatpush3.bf16.msra.mxu1 %v698_v37  ;;  %674 = vmatprep.subr.msk.bf16.mxu0 %vm917_vm3, %v672_v44 }
  0x1b   :  { %704 = vmatprep.subr.msk.bf16.mxu1 %vm917_vm3, %v702_v47 }
  0x1d   :  { %677 = vmatpush3.bf16.msk.msra.mxu0 %vm917_vm3, %v672_v44 }
  0x1e   :  { %707 = vmatpush3.bf16.msk.msra.mxu1 %vm917_vm3, %v702_v47  ;;  %709 = vmatprep.subr.bf16.mxu0 %v708_v53 }
  0x1f   :  { %739 = vmatprep.subr.bf16.mxu1 %v738_v54 }
  0x20   :  { %553 = vmatmul.mubr.msk.f32.vlgmr.msra.gmra.mrb[0].mxu0 %vm42_vm0, %v957_v59 }
  0x21   :  { %584 = vmatmul.mubr.msk.f32.vlgmr.msra.gmra.mrb[0].mxu1 %vm42_vm0, %v957_v59  ;;  %711 = vmatpush3.bf16.msra.mxu0 %v708_v53 }
  0x22   :  { %741 = vmatpush3.bf16.msra.mxu1 %v738_v54  ;;  %713 = vmatprep.subr.bf16.mxu0 %v712_v60 }
  0x23   :  { %743 = vmatprep.subr.bf16.mxu1 %v742_v61  ;;  %614 = vmatprep.mubr.msk.f32.mxu0 %vm42_vm0, %v865_v24 }
  0x24   :  { %645 = vmatprep.mubr.msk.f32.mxu1 %vm42_vm0, %v865_v24  ;;  %v328_v24 = vld [vmem:[%s1053_s3 + $0x60] sm:$0xff] }
  0x25   :  { %715 = vmatpush3.bf16.msra.mxu0 %v712_v60  ;;  %v762_v27 = vpack.c.bf16 %v329_v25, %v328_v24 }
  0x26   :  { %745 = vmatpush3.bf16.msra.mxu1 %v742_v61  ;;  %717 = vmatprep.subr.bf16.mxu0 %v716_v2 }
  0x27   :  { %747 = vmatprep.subr.bf16.mxu1 %v746_v3 }
  0x29   :  { %719 = vmatpush3.bf16.msra.mxu0 %v716_v2 }
  0x2a   :  { %749 = vmatpush3.bf16.msra.mxu1 %v746_v3  ;;  %721 = vmatprep.subr.bf16.mxu0 %v720_v8 }
  0x2b   :  { %751 = vmatprep.subr.bf16.mxu1 %v750_v9 }
  0x2d   :  { %723 = vmatpush3.bf16.msra.mxu0 %v720_v8 }
  0x2e   :  { %753 = vmatpush3.bf16.msra.mxu1 %v750_v9  ;;  %725 = vmatprep.subr.bf16.mxu0 %v724_v14 }
  0x2f   :  { %755 = vmatprep.subr.bf16.mxu1 %v754_v15 }
  0x31   :  { %727 = vmatpush3.bf16.msra.mxu0 %v724_v14 }
  0x32   :  { %757 = vmatpush3.bf16.msra.mxu1 %v754_v15  ;;  %729 = vmatprep.subr.bf16.mxu0 %v728_v20 }
  0x33   :  { %759 = vmatprep.subr.bf16.mxu1 %v758_v21 }
  0x35   :  { %731 = vmatpush3.bf16.msra.mxu0 %v728_v20 }
  0x36   :  { %761 = vmatpush3.bf16.msra.mxu1 %v758_v21  ;;  %734 = vmatprep.subr.msk.bf16.mxu0 %vm917_vm3, %v732_v26 }
  0x37   :  { %764 = vmatprep.subr.msk.bf16.mxu1 %vm917_vm3, %v762_v27 }
  0x39   :  { %737 = vmatpush3.bf16.msk.msra.mxu0 %vm917_vm3, %v732_v26 }
  0x3a   :  { %767 = vmatpush3.bf16.msk.msra.mxu1 %vm917_vm3, %v762_v27 }
  0x3c   :  { %615 = vmatmul.mubr.msk.f32.vlgmr.msra.gmra.mrb[2].mxu0 %vm42_vm0, %v957_v59 }
  0x3d   :  { %646 = vmatmul.mubr.msk.f32.vlgmr.msra.gmra.mrb[2].mxu1 %vm42_vm0, %v957_v59 }
  0x8b   :  { %v415_v34 = vpop.permute.xlu0 %414 }
  0x8c   :  { %v429_v35 = vpop.permute.xlu1 %428 }
  0x8f   :  { %v420_v43 = vpop.permute.xlu0 %419 }
  0x90   :  { %v434_v47 = vpop.permute.xlu1 %433 }
  0xf3   :  { %v554_v28 = vpop.f32.mrb[0].mxu0 }
  0xf4   :  { %v585_v29 = vpop.f32.mrb[0].mxu1  ;;  %v119_v30 = vpop.f32.mrb[1].mxu0 }
  0xf5   :  { %v221_v31 = vmax.f32 %v554_v28, %v585_v29  ;;  %v211_v32 = vpop.f32.mrb[1].mxu1 }
  0xf6   :  { %v220_v33 = vmax.f32 %v119_v30, %v211_v32 }
 0x10f   :  { %v616_v36 = vpop.f32.mrb[2].mxu0 }
 0x110   :  { %v315_v37 = vmax.f32 %v221_v31, %v616_v36  ;;  %v305_v38 = vpop.f32.mrb[3].mxu0  ;;  %v647_v39 = vpop.f32.mrb[2].mxu1 }
 0x111   :  { %v314_v40 = vmax.f32 %v220_v33, %v305_v38  ;;  %v399_v41 = vpop.f32.mrb[3].mxu1 }
 0x112   :  { %v409_v42 = vmax.f32 %v315_v37, %v647_v39 }
 0x113   :  { %v408_v44 = vmax.f32 %v314_v40, %v399_v41 }
 0x114   :  { %v423_v45 = vmul.f32 %v420_v43, %v409_v42 }
 0x115   :  { %v422_v46 = vmul.f32 %v415_v34, %v408_v44 }
 0x116   :  { %v437_v48 = vadd.f32 %v434_v47, %v423_v45 }
 0x117   :  { %v436_v49 = vadd.f32 %v429_v35, %v422_v46 }
 0x118   :  { %v439_v50 = vmax.f32 %v437_v48, 0.0 }
 0x119   :  { %v438_v51 = vmax.f32 %v436_v49, 0.0 }
 0x11a   :  { %443 = vst.msk [vmem:[%s1054_s7 + $0x8] sm:$0xf] %vm442_vm4, %v439_v50 }
 0x11b   :  { %441 = vst.msk [vmem:[%s1054_s7] sm:$0xff] %vm440_vm5, %v438_v51 }

// kernel: mynet2_forward.15
= control target key start
LH: loop header
LB: loop body
LE: loop exit
PB: predicated region body
PF: predicated region fallthrough
CT: control target
= control target key end

     0   :  { %v162_v2 = vmov 0.0|0.0   ;;  %vm163_vm0 = vmmov 0   ;;  %v164_v4 = vmov 0.0   ;;  %s213_s0 = inlined_call_operand.vmem [shape: f32[8,24], index: 0, kind: input, shape index: {}]   ;;  %s214_s1 = inlined_call_operand.vmem [shape: f32[24,100], index: 1, kind: input, shape index: {}]   ;;  %s215_s2 = inlined_call_operand.vmem [shape: f32[1,100], index: 2, kind: input, shape index: {}]   ;;  %s216_s3 = inlined_call_operand.hbm [shape: f32[8,100], index: 3, kind: output, shape index: {}]  }
   0x1   :  { %v16_v0 = vld [vmem:[%s214_s1] sm:$0xff]  ;;  %v17_v1 = vld [vmem:[%s214_s1 + $0x8] sm:$0xff]  ;;  %131 = vmatprep.subr.bf16.mxu0 %v162_v2  ;;  %128 = vmatprep.mubr.msk.f32.mxu0 %vm163_vm0, %v164_v4 }
   0x2   :  { %v132_v3 = vpack.c.bf16 %v17_v1, %v16_v0 }
   0x3   :  { %8 = vsyncpa [#allocation3], 0  ;;  %v18_v5 = vld [vmem:[%s214_s1 + $0x10] sm:$0xff]  ;;  %v15_v6 = vld [vmem:[%s213_s0] sm:$0xff]  ;;  %vm26_vm1 = vcmask 195584   ;;  %s165_s22 = smov [#allocation2]  }
   0x4   :  { %133 = vmatpush3.bf16.msra.mxu0 %v132_v3  ;;  %v116_v7 = vld [vmem:[%s215_s2] ss:$0 sm:$0xff]  ;;  %s108_s23 = sshll.u32 %s165_s22, 4  ;;  %vm100_vm2 = vcmask 818176   ;;  %s109_s23 = int_to_ptr.vmem [resolvable:$true] %s108_s23 }
   0x5   :  { %126 = vmatprep.subr.mxu0 %v164_v4  ;;  %s138_s1 = scalar_lea.vmem %s109_s23, 128  ;;  %p143_p1 = scmp.lt.s32.totalorder %s109_s23, %s109_s23 }
   0x6   :  { %p139_p0 = scmp.ne.s32.totalorder %s109_s23, %s138_s1  ;;  %p144_p2 = scmp.lt.s32.totalorder %s138_s1, %s138_s1 }
   0x8   :  { %127 = vmatpush3.msra.mxu0 %v18_v5  ;;  %p145_p3 = por %p144_p2, %p143_p1 }
   0x9   :  { %129 = vmatmul.mubr.msk.f32.vlgmr.msra.gmra.mrb[0].mxu0 %vm26_vm1, %v15_v6 }
   0xa   :  { %p146_p4 = pnand %p145_p3, %p139_p0 }
  0xdc   :  { %v96_v8 = vpop.f32.mrb[0].mxu0 }
  0xdd   :  { %v97_v9 = vadd.f32 %v116_v7, %v96_v8  ;;  %v130_v10 = vpop.f32.mrb[1].mxu0 }
  0xdf   :  { %101 = vst.msk [vmem:[#allocation2] sm:$0xff] %vm100_vm2, %v97_v9 }
  0xe0   :  { %149 = shalt.err (!%p146_p4)
}
  0xe1   :  { %s150_s25 = scalar_lea.hbm %s216_s3, 128 }
  0xe2   :  { %p151_p5 = scmp.ne.s32.totalorder %s216_s3, %s150_s25  ;;  %p154_p6 = scmp.lt.u32.totalorder %s150_s25, %s216_s3 }
  0xe4   :  { %p156_p7 = pnand %p154_p6, %p151_p5 }
  0xe6   :  { %159 = shalt.err (!%p156_p7)
}
  0xe7   :  { %111 = dma.vmem_to_hbm [thread:$0]  %s109_s23, 128, %s216_s3, [#allocation3]  }
  0xe8   :  { %160 = dma.done.wait [#allocation3], 128  }
  0xe9   :  { %161 = vsyncadd [#allocation3], 4294967168 }
  0xea   :  { %115 = vsyncpa [#allocation3], 1 }

// kernel: mynet2_forward.14
= control target key start
LH: loop header
LB: loop body
LE: loop exit
PB: predicated region body
PF: predicated region fallthrough
CT: control target
= control target key end

     0   :  { %v817_v0 = vmov 0.0|0.0   ;;  %vm818_vm0 = vmmov 0   ;;  %v819_v8 = vmov 0.0   ;;  %v820_v12 = vmov 0   ;;  %s1157_s0 = inlined_call_operand.vmem [shape: f32[108,8], index: 0, kind: input, shape index: {}]   ;;  %s1158_s1 = inlined_call_operand.vmem [shape: f32[108,8], index: 1, kind: input, shape index: {}]   ;;  %s1159_s5 = inlined_call_operand.vmem [shape: f32[24,1], index: 5, kind: input, shape index: {}]   ;;  %s1160_s6 = inlined_call_operand.vmem [shape: f32[24,1], index: 6, kind: input, shape index: {}]   ;;  %s1161_s2 = inlined_call_operand.vmem [shape: f32[108,8], index: 2, kind: input, shape index: {}]   ;;  %s1162_s3 = inlined_call_operand.vmem [shape: f32[108,8], index: 3, kind: input, shape index: {}]   ;;  %s1163_s4 = inlined_call_operand.vmem [shape: f32[24,108], index: 4, kind: input, shape index: {}]   ;;  %s1164_s7 = inlined_call_operand.vmem [shape: f32[24,8], index: 7, kind: output, shape index: {}]  }
   0x1   :  { %722 = vmatprep.subr.bf16.mxu0 %v817_v0  ;;  %v29_v1 = vld [vmem:[%s1157_s0] sm:$0xff]  ;;  %v30_v2 = vld [vmem:[%s1157_s0 + $0x8] sm:$0xff]  ;;  %744 = vmatprep.subr.bf16.mxu1 %v817_v0  ;;  %v31_v6 = vld [vmem:[%s1157_s0 + $0x10] sm:$0xff]  ;;  %vm53_vm1 = vcmask 1043456   ;;  %vm821_vm2 = vmmov 1   ;;  %vm43_vm4 = vcmask 883712  }
   0x2   :  { %v137_v3 = vld [vmem:[%s1158_s1] sm:$0xff]  ;;  %v723_v4 = vpack.c.bf16 %v30_v2, %v29_v1  ;;  %v138_v5 = vld [vmem:[%s1158_s1 + $0x8] sm:$0xff]  ;;  %v32_v7 = vld [vmem:[%s1157_s0 + $0x18] sm:$0xff]  ;;  %602 = vmatprep.mubr.msk.f32.mxu0 %vm818_vm0, %v819_v8  ;;  %639 = vmatprep.mubr.msk.f32.mxu1 %vm818_vm0, %v819_v8  ;;  %vm482_vm5 = vcmask 64512  }
   0x3   :  { %v745_v9 = vpack.c.bf16 %v138_v5, %v137_v3  ;;  %v139_v10 = vld [vmem:[%s1158_s1 + $0x10] sm:$0xff]  ;;  %v140_v11 = vld [vmem:[%s1158_s1 + $0x18] sm:$0xff]  ;;  %816 = vset.pattern.permute.xlu1 %v820_v12  ;;  %815 = vset.pattern.permute.xlu0 %v820_v12  ;;  %v726_v13 = vpack.c.bf16 %v32_v7, %v31_v6  ;;  %v33_v15 = vld [vmem:[%s1157_s0 + $0x20] sm:$0xff] }
   0x4   :  { %724 = vmatpush3.bf16.msra.mxu0 %v723_v4  ;;  %v748_v14 = vpack.c.bf16 %v140_v11, %v139_v10  ;;  %v34_v16 = vld [vmem:[%s1157_s0 + $0x28] sm:$0xff]  ;;  %v141_v17 = vld [vmem:[%s1158_s1 + $0x20] sm:$0xff]  ;;  %v35_v21 = vld [vmem:[%s1157_s0 + $0x30] sm:$0xff] }
   0x5   :  { %746 = vmatpush3.bf16.msra.mxu1 %v745_v9  ;;  %725 = vmatprep.subr.bf16.mxu0 %v817_v0  ;;  %v142_v18 = vld [vmem:[%s1158_s1 + $0x28] sm:$0xff]  ;;  %v729_v19 = vpack.c.bf16 %v34_v16, %v33_v15  ;;  %v36_v22 = vld [vmem:[%s1157_s0 + $0x38] sm:$0xff]  ;;  %v143_v23 = vld [vmem:[%s1158_s1 + $0x30] sm:$0xff] }
   0x6   :  { %747 = vmatprep.subr.bf16.mxu1 %v817_v0  ;;  %v751_v20 = vpack.c.bf16 %v142_v18, %v141_v17  ;;  %v144_v24 = vld [vmem:[%s1158_s1 + $0x38] sm:$0xff]  ;;  %v732_v25 = vpack.c.bf16 %v36_v22, %v35_v21  ;;  %v37_v27 = vld [vmem:[%s1157_s0 + $0x40] sm:$0xff]  ;;  %v38_v28 = vld [vmem:[%s1157_s0 + $0x48] sm:$0xff] }
   0x7   :  { %v754_v26 = vpack.c.bf16 %v144_v24, %v143_v23  ;;  %v145_v29 = vld [vmem:[%s1158_s1 + $0x40] sm:$0xff]  ;;  %v146_v30 = vld [vmem:[%s1158_s1 + $0x48] sm:$0xff]  ;;  %v735_v31 = vpack.c.bf16 %v38_v28, %v37_v27  ;;  %v39_v33 = vld [vmem:[%s1157_s0 + $0x50] sm:$0xff] }
   0x8   :  { %727 = vmatpush3.bf16.msra.mxu0 %v726_v13  ;;  %v757_v32 = vpack.c.bf16 %v146_v30, %v145_v29  ;;  %v40_v34 = vld [vmem:[%s1157_s0 + $0x58] sm:$0xff]  ;;  %v147_v35 = vld [vmem:[%s1158_s1 + $0x50] sm:$0xff]  ;;  %v41_v38 = vld [vmem:[%s1157_s0 + $0x60] sm:$0xff] }
   0x9   :  { %749 = vmatpush3.bf16.msra.mxu1 %v748_v14  ;;  %728 = vmatprep.subr.bf16.mxu0 %v817_v0  ;;  %v148_v36 = vld [vmem:[%s1158_s1 + $0x58] sm:$0xff]  ;;  %v738_v37 = vpack.c.bf16 %v40_v34, %v39_v33  ;;  %v42_v40 = vld [vmem:[%s1157_s0 + $0x68] sm:$0xf]  ;;  %v439_v41 = vld [vmem:[%s1159_s5 + $0x10] sm:$0xff] }
   0xa   :  { %750 = vmatprep.subr.bf16.mxu1 %v817_v0  ;;  %v760_v39 = vpack.c.bf16 %v148_v36, %v147_v35  ;;  %v437_v42 = vld [vmem:[%s1159_s5] sm:$0xff]  ;;  %v150_v44 = vld [vmem:[%s1158_s1 + $0x68] sm:$0xf]  ;;  %452 = vperm.xlu1 %816, %v439_v41   ;;  %v741_v46 = vpack.c.bf16 %v42_v40, %v41_v38  ;;  %vm975_vm3 = vmpackc.low %vm53_vm1, %vm821_vm2 }
   0xb   :  { %v149_v43 = vld [vmem:[%s1158_s1 + $0x60] sm:$0xff]  ;;  %442 = vperm.xlu0 %815, %v437_v42   ;;  %v438_v47 = vld [vmem:[%s1159_s5 + $0x8] sm:$0xff]  ;;  %v460_v54 = vld [vmem:[%s1160_s6 + $0x10] sm:$0xff] }
   0xc   :  { %730 = vmatpush3.bf16.msra.mxu0 %v729_v19  ;;  %v458_v45 = vld [vmem:[%s1160_s6] sm:$0xff]  ;;  %v763_v49 = vpack.c.bf16 %v150_v44, %v149_v43  ;;  %v238_v51 = vld [vmem:[%s1161_s2 + $0x8] sm:$0xff]  ;;  %v239_v59 = vld [vmem:[%s1161_s2 + $0x10] sm:$0xff] }
   0xd   :  { %752 = vmatpush3.bf16.msra.mxu1 %v751_v20  ;;  %731 = vmatprep.subr.bf16.mxu0 %v817_v0  ;;  %v237_v50 = vld [vmem:[%s1161_s2] sm:$0xff]  ;;  %v338_v53 = vld [vmem:[%s1162_s3 + $0x8] sm:$0xff]  ;;  %v240_v60 = vld [vmem:[%s1161_s2 + $0x18] sm:$0xff] }
   0xe   :  { %753 = vmatprep.subr.bf16.mxu1 %v817_v0  ;;  %v337_v52 = vld [vmem:[%s1162_s3] sm:$0xff]  ;;  %463 = vperm.xlu1 %816, %v458_v45   ;;  %v767_v56 = vpack.c.bf16 %v238_v51, %v237_v50  ;;  %v459_v57 = vld [vmem:[%s1160_s6 + $0x8] sm:$0xff]  ;;  %v339_v61 = vld [vmem:[%s1162_s3 + $0x10] sm:$0xff]  ;;  %v770_v63 = vpack.c.bf16 %v240_v60, %v239_v59 }
   0xf   :  { %447 = vperm.xlu0 %815, %v438_v47   ;;  %v1000_v55 = vld [vmem:[%s1163_s4] sm:$0xff]  ;;  %v789_v58 = vpack.c.bf16 %v338_v53, %v337_v52  ;;  %v340_v62 = vld [vmem:[%s1162_s3 + $0x18] sm:$0xff]  ;;  %v1028_v1 = vld [vmem:[%s1163_s4 + $0x8] sm:$0xff] }
  0x10   :  { %733 = vmatpush3.bf16.msra.mxu0 %v732_v25  ;;  %v792_v2 = vpack.c.bf16 %v340_v62, %v339_v61  ;;  %v241_v3 = vld [vmem:[%s1161_s2 + $0x20] sm:$0xff]  ;;  %v242_v4 = vld [vmem:[%s1161_s2 + $0x28] sm:$0xff]  ;;  %v28_v9 = vld [vmem:[%s1163_s4 + $0x10] sm:$0xff] }
  0x11   :  { %755 = vmatpush3.bf16.msra.mxu1 %v754_v26  ;;  %734 = vmatprep.subr.bf16.mxu0 %v817_v0  ;;  %v341_v5 = vld [vmem:[%s1162_s3 + $0x20] sm:$0xff]  ;;  %v342_v6 = vld [vmem:[%s1162_s3 + $0x28] sm:$0xff]  ;;  %v773_v7 = vpack.c.bf16 %v242_v4, %v241_v3  ;;  %v243_v11 = vld [vmem:[%s1161_s2 + $0x30] sm:$0xff] }
  0x12   :  { %756 = vmatprep.subr.bf16.mxu1 %v817_v0  ;;  %473 = vperm.xlu1 %816, %v460_v54   ;;  %v795_v10 = vpack.c.bf16 %v342_v6, %v341_v5  ;;  %v244_v12 = vld [vmem:[%s1161_s2 + $0x38] sm:$0xff]  ;;  %v343_v13 = vld [vmem:[%s1162_s3 + $0x30] sm:$0xff]  ;;  %v245_v17 = vld [vmem:[%s1161_s2 + $0x40] sm:$0xff] }
  0x13   :  { %468 = vperm.xlu0 %815, %v459_v57   ;;  %v344_v14 = vld [vmem:[%s1162_s3 + $0x38] sm:$0xff]  ;;  %v776_v15 = vpack.c.bf16 %v244_v12, %v243_v11  ;;  %v246_v18 = vld [vmem:[%s1161_s2 + $0x48] sm:$0xff]  ;;  %v345_v19 = vld [vmem:[%s1162_s3 + $0x40] sm:$0xff] }
  0x14   :  { %736 = vmatpush3.bf16.msra.mxu0 %v735_v31  ;;  %v798_v16 = vpack.c.bf16 %v344_v14, %v343_v13  ;;  %v346_v20 = vld [vmem:[%s1162_s3 + $0x48] sm:$0xff]  ;;  %v779_v21 = vpack.c.bf16 %v246_v18, %v245_v17  ;;  %v247_v23 = vld [vmem:[%s1161_s2 + $0x50] sm:$0xff]  ;;  %v248_v24 = vld [vmem:[%s1161_s2 + $0x58] sm:$0xff] }
  0x15   :  { %758 = vmatpush3.bf16.msra.mxu1 %v757_v32  ;;  %737 = vmatprep.subr.bf16.mxu0 %v817_v0  ;;  %v801_v22 = vpack.c.bf16 %v346_v20, %v345_v19  ;;  %v347_v25 = vld [vmem:[%s1162_s3 + $0x50] sm:$0xff]  ;;  %v348_v26 = vld [vmem:[%s1162_s3 + $0x58] sm:$0xff]  ;;  %v782_v27 = vpack.c.bf16 %v248_v24, %v247_v23  ;;  %v249_v29 = vld [vmem:[%s1161_s2 + $0x60] sm:$0xff] }
  0x16   :  { %759 = vmatprep.subr.bf16.mxu1 %v817_v0  ;;  %v804_v28 = vpack.c.bf16 %v348_v26, %v347_v25  ;;  %v250_v30 = vld [vmem:[%s1161_s2 + $0x68] sm:$0xf]  ;;  %v349_v31 = vld [vmem:[%s1162_s3 + $0x60] sm:$0xff] }
  0x17   :  { %v350_v32 = vld [vmem:[%s1162_s3 + $0x68] sm:$0xf]  ;;  %v785_v33 = vpack.c.bf16 %v250_v30, %v249_v29 }
  0x18   :  { %739 = vmatpush3.bf16.msra.mxu0 %v738_v37  ;;  %v807_v34 = vpack.c.bf16 %v350_v32, %v349_v31 }
  0x19   :  { %761 = vmatpush3.bf16.msra.mxu1 %v760_v39  ;;  %740 = vmatprep.subr.bf16.mxu0 %v817_v0 }
  0x1a   :  { %762 = vmatprep.subr.bf16.mxu1 %v817_v0 }
  0x1c   :  { %743 = vmatpush3.bf16.msk.msra.mxu0 %vm975_vm3, %v741_v46 }
  0x1d   :  { %765 = vmatpush3.bf16.msk.msra.mxu1 %vm975_vm3, %v763_v49  ;;  %766 = vmatprep.subr.bf16.mxu0 %v817_v0 }
  0x1e   :  { %788 = vmatprep.subr.bf16.mxu1 %v817_v0 }
  0x1f   :  { %603 = vmatmul.mubr.msk.f32.vlgmr.msra.gmra.mrb[0].mxu0 %vm43_vm4, %v1000_v55 }
  0x20   :  { %640 = vmatmul.mubr.msk.f32.vlgmr.msra.gmra.mrb[0].mxu1 %vm43_vm4, %v1000_v55  ;;  %768 = vmatpush3.bf16.msra.mxu0 %v767_v56 }
  0x21   :  { %790 = vmatpush3.bf16.msra.mxu1 %v789_v58  ;;  %769 = vmatprep.subr.bf16.mxu0 %v817_v0 }
  0x22   :  { %791 = vmatprep.subr.bf16.mxu1 %v817_v0  ;;  %605 = vmatprep.mubr.msk.f32.mxu0 %vm818_vm0, %v819_v8 }
  0x23   :  { %606 = vmatmul.mubr.msk.f32.gmra.mrb[2].mxu0 %vm43_vm4, %v1028_v1  ;;  %642 = vmatprep.mubr.msk.f32.mxu1 %vm818_vm0, %v819_v8 }
  0x24   :  { %771 = vmatpush3.bf16.msra.mxu0 %v770_v63  ;;  %643 = vmatmul.mubr.msk.f32.gmra.mrb[2].mxu1 %vm43_vm4, %v1028_v1 }
  0x25   :  { %793 = vmatpush3.bf16.msra.mxu1 %v792_v2  ;;  %772 = vmatprep.subr.bf16.mxu0 %v817_v0 }
  0x26   :  { %794 = vmatprep.subr.bf16.mxu1 %v817_v0  ;;  %608 = vmatprep.mubr.msk.f32.mxu0 %vm818_vm0, %v819_v8 }
  0x27   :  { %609 = vmatmul.mubr.msk.f32.gmra.mrb[4].mxu0 %vm43_vm4, %v28_v9  ;;  %645 = vmatprep.mubr.msk.f32.mxu1 %vm818_vm0, %v819_v8 }
  0x28   :  { %774 = vmatpush3.bf16.msra.mxu0 %v773_v7  ;;  %646 = vmatmul.mubr.msk.f32.gmra.mrb[4].mxu1 %vm43_vm4, %v28_v9 }
  0x29   :  { %796 = vmatpush3.bf16.msra.mxu1 %v795_v10  ;;  %775 = vmatprep.subr.bf16.mxu0 %v817_v0 }
  0x2a   :  { %797 = vmatprep.subr.bf16.mxu1 %v817_v0  ;;  %676 = vmatprep.mubr.msk.f32.mxu0 %vm818_vm0, %v819_v8 }
  0x2b   :  { %713 = vmatprep.mubr.msk.f32.mxu1 %vm818_vm0, %v819_v8 }
  0x2c   :  { %777 = vmatpush3.bf16.msra.mxu0 %v776_v15 }
  0x2d   :  { %799 = vmatpush3.bf16.msra.mxu1 %v798_v16  ;;  %778 = vmatprep.subr.bf16.mxu0 %v817_v0 }
  0x2e   :  { %800 = vmatprep.subr.bf16.mxu1 %v817_v0 }
  0x30   :  { %780 = vmatpush3.bf16.msra.mxu0 %v779_v21 }
  0x31   :  { %802 = vmatpush3.bf16.msra.mxu1 %v801_v22  ;;  %781 = vmatprep.subr.bf16.mxu0 %v817_v0 }
  0x32   :  { %803 = vmatprep.subr.bf16.mxu1 %v817_v0 }
  0x34   :  { %783 = vmatpush3.bf16.msra.mxu0 %v782_v27 }
  0x35   :  { %805 = vmatpush3.bf16.msra.mxu1 %v804_v28  ;;  %784 = vmatprep.subr.bf16.mxu0 %v817_v0 }
  0x36   :  { %806 = vmatprep.subr.bf16.mxu1 %v817_v0 }
  0x38   :  { %787 = vmatpush3.bf16.msk.msra.mxu0 %vm975_vm3, %v785_v33 }
  0x39   :  { %809 = vmatpush3.bf16.msk.msra.mxu1 %vm975_vm3, %v807_v34 }
  0x3b   :  { %677 = vmatmul.mubr.msk.f32.vlgmr.msra.gmra.mrb[6].mxu0 %vm43_vm4, %v1000_v55 }
  0x3c   :  { %714 = vmatmul.mubr.msk.f32.vlgmr.msra.gmra.mrb[6].mxu1 %vm43_vm4, %v1000_v55  ;;  %679 = vmatprep.mubr.msk.f32.mxu0 %vm818_vm0, %v819_v8 }
  0x3d   :  { %716 = vmatprep.mubr.msk.f32.mxu1 %vm818_vm0, %v819_v8 }
  0x3f   :  { %680 = vmatmul.mubr.msk.f32.gmra.mrb[8].mxu0 %vm43_vm4, %v1028_v1 }
  0x40   :  { %717 = vmatmul.mubr.msk.f32.gmra.mrb[8].mxu1 %vm43_vm4, %v1028_v1  ;;  %682 = vmatprep.mubr.msk.f32.mxu0 %vm818_vm0, %v819_v8 }
  0x41   :  { %719 = vmatprep.mubr.msk.f32.mxu1 %vm818_vm0, %v819_v8 }
  0x43   :  { %683 = vmatmul.mubr.msk.f32.gmra.mrb[10].mxu0 %vm43_vm4, %v28_v9 }
  0x44   :  { %720 = vmatmul.mubr.msk.f32.gmra.mrb[10].mxu1 %vm43_vm4, %v28_v9 }
  0x89   :  { %v453_v49 = vpop.permute.xlu1 %452 }
  0x8a   :  { %v443_v8 = vpop.permute.xlu0 %442 }
  0x8d   :  { %v464_v62 = vpop.permute.xlu1 %463 }
  0x8e   :  { %v448_v56 = vpop.permute.xlu0 %447 }
  0x91   :  { %v474_v16 = vpop.permute.xlu1 %473 }
  0x92   :  { %v469_v10 = vpop.permute.xlu0 %468 }
  0xf2   :  { %v123_v0 = vpop.f32.mrb[0].mxu0 }
  0xf3   :  { %v604_v35 = vpop.f32.mrb[1].mxu0  ;;  %v220_v36 = vpop.f32.mrb[0].mxu1 }
  0xf4   :  { %v234_v37 = vmax.f32 %v123_v0, %v220_v36  ;;  %v641_v38 = vpop.f32.mrb[1].mxu1 }
  0xf6   :  { %v128_v39 = vpop.f32.mrb[2].mxu0 }
  0xf7   :  { %v607_v40 = vpop.f32.mrb[3].mxu0  ;;  %v225_v41 = vpop.f32.mrb[2].mxu1 }
  0xf8   :  { %v235_v42 = vmax.f32 %v128_v39, %v225_v41  ;;  %v644_v43 = vpop.f32.mrb[3].mxu1 }
  0xfa   :  { %v133_v44 = vpop.f32.mrb[4].mxu0 }
  0xfb   :  { %v610_v45 = vpop.f32.mrb[5].mxu0  ;;  %v230_v46 = vpop.f32.mrb[4].mxu1 }
  0xfc   :  { %v236_v47 = vmax.f32 %v133_v44, %v230_v46  ;;  %v647_v48 = vpop.f32.mrb[5].mxu1 }
 0x10e   :  { %v320_v50 = vpop.f32.mrb[6].mxu0 }
 0x10f   :  { %v334_v51 = vmax.f32 %v234_v37, %v320_v50  ;;  %v678_v52 = vpop.f32.mrb[7].mxu0  ;;  %v420_v53 = vpop.f32.mrb[6].mxu1 }
 0x110   :  { %v715_v54 = vpop.f32.mrb[7].mxu1 }
 0x111   :  { %v434_v55 = vmax.f32 %v334_v51, %v420_v53 }
 0x112   :  { %v325_v57 = vpop.f32.mrb[8].mxu0 }
 0x113   :  { %v455_v58 = vmul.f32 %v443_v8, %v434_v55  ;;  %v335_v59 = vmax.f32 %v235_v42, %v325_v57  ;;  %v681_v60 = vpop.f32.mrb[9].mxu0  ;;  %v425_v61 = vpop.f32.mrb[8].mxu1 }
 0x114   :  { %v718_v63 = vpop.f32.mrb[9].mxu1 }
 0x115   :  { %v476_v1 = vadd.f32 %v464_v62, %v455_v58  ;;  %v435_v2 = vmax.f32 %v335_v59, %v425_v61 }
 0x116   :  { %v330_v3 = vpop.f32.mrb[10].mxu0 }
 0x117   :  { %v479_v4 = vmax.f32 %v476_v1, 0.0  ;;  %v456_v5 = vmul.f32 %v448_v56, %v435_v2  ;;  %v336_v6 = vmax.f32 %v236_v47, %v330_v3  ;;  %v684_v7 = vpop.f32.mrb[11].mxu0  ;;  %v430_v9 = vpop.f32.mrb[10].mxu1 }
 0x118   :  { %v721_v11 = vpop.f32.mrb[11].mxu1 }
 0x119   :  { %483 = vst.msk [vmem:[%s1164_s7] sm:$0xff] %vm482_vm5, %v479_v4  ;;  %v477_v12 = vadd.f32 %v469_v10, %v456_v5  ;;  %v436_v13 = vmax.f32 %v336_v6, %v430_v9 }
 0x11b   :  { %v480_v14 = vmax.f32 %v477_v12, 0.0  ;;  %v457_v15 = vmul.f32 %v453_v49, %v436_v13 }
 0x11d   :  { %484 = vst.msk [vmem:[%s1164_s7 + $0x8] sm:$0xff] %vm482_vm5, %v480_v14  ;;  %v478_v17 = vadd.f32 %v474_v16, %v457_v15 }
 0x11f   :  { %v481_v18 = vmax.f32 %v478_v17, 0.0 }
 0x121   :  { %485 = vst.msk [vmem:[%s1164_s7 + $0x10] sm:$0xff] %vm482_vm5, %v481_v18 }

</bundles_post_ra>
